<compile_context>
chip_gen: v7x
topology: tpu7x:2x2x1
jax: 0.10.0
libtpu: 0.0.40
codegen_flags: <defaults>
</compile_context>

<pallas_src>
import math
import functools

import jax
import jax.numpy as jnp
from jax.experimental import pallas as pl
from jax.experimental.pallas import tpu as pltpu


# ---------------------------------------------------------------- kernel ----
def _layernorm(x, gamma, beta, eps):
    mean = jnp.mean(x, axis=-1, keepdims=True)
    xc = x - mean
    var = jnp.mean(xc * xc, axis=-1, keepdims=True)
    return xc * jax.lax.rsqrt(var + eps) * gamma + beta


def _fused_kernel(x_ref, pe_ref, mask_ref,
                  wq_ref, bq_ref, wk_ref, bk_ref, wv_ref, bv_ref,
                  wo_ref, bo_ref,
                  ln1_g_ref, ln1_b_ref,
                  w1_ref, b1_ref, w2_ref, b2_ref,
                  ln2_g_ref, ln2_b_ref,
                  wdec_ref, bdec_ref,
                  o_ref, *,
                  nhead, hpad, batch, seq, eps):
    f32 = jnp.float32
    bf16 = jnp.bfloat16

    # scaled embedding (sqrt(d_model) folded into the table) + positional enc.
    x = x_ref[...] + pe_ref[...]                         # (M, D) f32
    # dropout (p=0.2) -> eval-mode identity
    mask = mask_ref[...]                                 # (S, S) f32 additive

    # ---- Q / K / V projections (bf16 operands, f32 accumulate) ----
    xb = x.astype(bf16)
    q = jnp.dot(xb, wq_ref[...], preferred_element_type=f32) + bq_ref[...]
    k = jnp.dot(xb, wk_ref[...], preferred_element_type=f32) + bk_ref[...]
    v = jnp.dot(xb, wv_ref[...], preferred_element_type=f32) + bv_ref[...]

    # ---- per-batch, per-head attention (static, fully unrolled) ----
    batch_outs = []
    for b in range(batch):                               # B is tiny & static
        rows = slice(b * seq, (b + 1) * seq)             # sublane-aligned
        head_outs = []
        for h in range(nhead):
            cols = slice(h * hpad, (h + 1) * hpad)       # 128-lane aligned
            qb = q[rows, cols].astype(bf16)
            kb = k[rows, cols].astype(bf16)
            vb = v[rows, cols].astype(bf16)
            # scores (S, S); attn_scale already folded into Wq
            s = jax.lax.dot_general(qb, kb, (((1,), (1,)), ((), ())),
                                    preferred_element_type=f32)
            s = s + mask
            s = s - jnp.max(s, axis=-1, keepdims=True)
            p = jnp.exp(s)
            p = p * pl.reciprocal(jnp.sum(p, axis=-1, keepdims=True),
                                  approx=True)
            head_outs.append(jnp.dot(p.astype(bf16), vb,
                                     preferred_element_type=f32))
        batch_outs.append(jnp.concatenate(head_outs, axis=-1))   # (S, H*128)
    attn = jnp.concatenate(batch_outs, axis=0)                   # (M, H*128)

    a = jnp.dot(attn.astype(bf16), wo_ref[...],
                preferred_element_type=f32) + bo_ref[...]

    # residual + LayerNorm1 (post-norm, default TransformerEncoderLayer)
    x = _layernorm(x + a, ln1_g_ref[...], ln1_b_ref[...], eps)

    # feed-forward: relu(x @ W1 + b1) @ W2 + b2   (dropout -> identity)
    hid = jnp.maximum(
        jnp.dot(x.astype(bf16), w1_ref[...], preferred_element_type=f32)
        + b1_ref[...], 0.0)
    ff = jnp.dot(hid.astype(bf16), w2_ref[...], preferred_element_type=f32) \
        + b2_ref[...]

    # residual + LayerNorm2
    x = _layernorm(x + ff, ln2_g_ref[...], ln2_b_ref[...], eps)

    # vocab decoder (lane-padded to a multiple of 128 -> lane-dense store)
    o_ref[...] = (jnp.dot(x.astype(bf16), wdec_ref[...],
                          preferred_element_type=f32)
                  + bdec_ref[...]).astype(o_ref.dtype)


def fused_encoder_decoder(x_emb, pe_tiled, src_mask, p, *, nhead, batch, seq):
    """x_emb: (B*S, D) rows ordered (batch, seq); pe_tiled: (B*S, D);
    src_mask: (S, S) additive."""
    M = x_emb.shape[0]
    n_pad = p["dec_w"].shape[1]
    hpad = p["wq"].shape[1] // nhead

    inputs = (x_emb, pe_tiled, src_mask,
              p["wq"], p["bq"], p["wk"], p["bk"], p["wv"], p["bv"],
              p["wo"], p["bo"],
              p["ln1_g"], p["ln1_b"],
              p["w1"], p["b1"], p["w2"], p["b2"],
              p["ln2_g"], p["ln2_b"],
              p["dec_w"], p["dec_b"])

    kernel = functools.partial(_fused_kernel, nhead=nhead, hpad=hpad,
                               batch=batch, seq=seq, eps=1e-5)

    # Grid-less call: every operand lives whole in VMEM, no pipelining,
    # no double-buffering, no per-step grid overhead.
    return pl.pallas_call(
        kernel,
        out_shape=jax.ShapeDtypeStruct((M, n_pad), jnp.float32),
        in_specs=[pl.BlockSpec(memory_space=pltpu.MemorySpace.VMEM)
                  for _ in inputs],
        out_specs=pl.BlockSpec(memory_space=pltpu.MemorySpace.VMEM),
        compiler_params=pltpu.CompilerParams(
            vmem_limit_bytes=32 * 1024 * 1024),
    )(*inputs)


# ----------------------------------------------------------- params / glue ----
def positional_encoding(seq_len, d_model):
    position = jnp.arange(seq_len, dtype=jnp.float32)[:, None]
    div_term = jnp.exp(jnp.arange(0, d_model, 2, dtype=jnp.float32)
                       * (-math.log(10000.0) / d_model))
    pe = jnp.zeros((seq_len, d_model), jnp.float32)
    pe = pe.at[:, 0::2].set(jnp.sin(position * div_term))
    pe = pe.at[:, 1::2].set(jnp.cos(position * div_term))
    return pe  # (seq_len, d_model)


def init_params(key, ntoken, d_model, nhead, d_hid):
    """Synthetic deterministic init.  All matmul weights are stored
    pre-transposed (K, N), bf16, with per-head columns/rows zero-padded so
    each head occupies a 128-lane-aligned slab; biases are f32 (1, N).
    sqrt(d_model) is folded into the embedding table and 1/sqrt(head_dim)
    into Wq."""
    head_dim = d_model // nhead
    hpad = ((head_dim + 127) // 128) * 128         # 100 -> 128
    n_pad = ((ntoken + 127) // 128) * 128          # lane-align decoder output
    attn_scale = 1.0 / math.sqrt(head_dim)
    initrange = 0.1
    ks = jax.random.split(key, 8)

    def pad_head_cols(w):   # (d_model, nhead*head_dim) -> (d_model, nhead*hpad)
        w = w.reshape(d_model, nhead, head_dim)
        w = jnp.pad(w, ((0, 0), (0, 0), (0, hpad - head_dim)))
        return w.reshape(d_model, nhead * hpad)

    def pad_head_rows(w):   # (nhead*head_dim, d_model) -> (nhead*hpad, d_model)
        w = w.reshape(nhead, head_dim, d_model)
        w = jnp.pad(w, ((0, 0), (0, hpad - head_dim), (0, 0)))
        return w.reshape(nhead * hpad, d_model)

    p = {}
    p["embed"] = (jax.random.uniform(ks[0], (ntoken, d_model), jnp.float32,
                                     -initrange, initrange)
                  * math.sqrt(d_model))                      # scale folded in

    wq = 0.05 * jax.random.normal(ks[1], (d_model, d_model), jnp.float32)
    wk = 0.05 * jax.random.normal(ks[2], (d_model, d_model), jnp.float32)
    wv = 0.05 * jax.random.normal(ks[3], (d_model, d_model), jnp.float32)
    p["wq"] = (pad_head_cols(wq) * attn_scale).astype(jnp.bfloat16)
    p["wk"] = pad_head_cols(wk).astype(jnp.bfloat16)
    p["wv"] = pad_head_cols(wv).astype(jnp.bfloat16)
    p["bq"] = jnp.zeros((1, nhead * hpad), jnp.float32)
    p["bk"] = jnp.zeros((1, nhead * hpad), jnp.float32)
    p["bv"] = jnp.zeros((1, nhead * hpad), jnp.float32)

    wo = 0.05 * jax.random.normal(ks[4], (d_model, d_model), jnp.float32)
    p["wo"] = pad_head_rows(wo).astype(jnp.bfloat16)
    p["bo"] = jnp.zeros((1, d_model), jnp.float32)

    p["ln1_g"] = jnp.ones((1, d_model), jnp.float32)
    p["ln1_b"] = jnp.zeros((1, d_model), jnp.float32)
    p["ln2_g"] = jnp.ones((1, d_model), jnp.float32)
    p["ln2_b"] = jnp.zeros((1, d_model), jnp.float32)

    p["w1"] = (0.05 * jax.random.normal(ks[5], (d_model, d_hid),
                                        jnp.float32)).astype(jnp.bfloat16)
    p["b1"] = jnp.zeros((1, d_hid), jnp.float32)
    p["w2"] = (0.05 * jax.random.normal(ks[6], (d_hid, d_model),
                                        jnp.float32)).astype(jnp.bfloat16)
    p["b2"] = jnp.zeros((1, d_model), jnp.float32)

    dec_w = jax.random.uniform(ks[7], (d_model, ntoken), jnp.float32,
                               -initrange, initrange)
    p["dec_w"] = jnp.pad(dec_w, ((0, 0), (0, n_pad - ntoken))
                         ).astype(jnp.bfloat16)              # (D, n_pad)
    p["dec_b"] = jnp.zeros((1, n_pad), jnp.float32)
    return p


@functools.partial(jax.jit, static_argnames=("d_model", "nhead", "ntoken"))
def transformer_forward(params, src, src_mask, *, d_model, nhead, ntoken):
    """src: (S, B) int32; src_mask: (S, S) additive float. Returns (S, B, ntoken)."""
    S, B = src.shape
    M = B * S

    # embedding gather (tiny XLA gather); rows ordered (batch, seq);
    # sqrt(d_model) scale already folded into the table.
    emb = jnp.take(params["embed"], src.T, axis=0).reshape(M, d_model)

    # positional encoding, pre-tiled over batch (constant for fixed S, B)
    pe_tiled = jnp.tile(positional_encoding(S, d_model), (B, 1))     # (M, D)

    out_pad = fused_encoder_decoder(
        emb, pe_tiled, src_mask.astype(jnp.float32), params,
        nhead=nhead, batch=B, seq=S)                                 # (M, n_pad)

    # drop vocab padding, restore (S, B, ntoken) layout (tiny tensor)
    return out_pad[:, :ntoken].reshape(B, S, ntoken).transpose(1, 0, 2)


# ------------------------------------------------------------------- main ----
if __name__ == "__main__":
    ntoken, d_model, nhead, d_hid = 96, 200, 2, 200
    S, B = 8, 2

    key = jax.random.PRNGKey(0)
    kp, ks = jax.random.split(key)
    params = init_params(kp, ntoken, d_model, nhead, d_hid)

    src = jax.random.randint(ks, (S, B), 0, ntoken, dtype=jnp.int32)
    # additive causal mask, like nn.Transformer.generate_square_subsequent_mask
    src_mask = jnp.where(jnp.triu(jnp.ones((S, S), dtype=bool), k=1),
                         -1e9, 0.0).astype(jnp.float32)

    out = transformer_forward(params, src, src_mask,
                              d_model=d_model, nhead=nhead, ntoken=ntoken)
    out = jax.block_until_ready(out)

    assert out.shape == (S, B, ntoken), out.shape
    assert bool(jnp.all(jnp.isfinite(out)))
    print("KERNEL_OK")
</pallas_src>

<mosaic_0001>
module attributes {stable_mosaic.version = 11 : i64} {
  func.func @_fused_kernel(%arg0: memref<16x200xf32, #tpu.memory_space<vmem>>, %arg1: memref<16x200xf32, #tpu.memory_space<vmem>>, %arg2: memref<8x8xf32, #tpu.memory_space<vmem>>, %arg3: memref<200x256xbf16, #tpu.memory_space<vmem>>, %arg4: memref<1x256xf32, #tpu.memory_space<vmem>>, %arg5: memref<200x256xbf16, #tpu.memory_space<vmem>>, %arg6: memref<1x256xf32, #tpu.memory_space<vmem>>, %arg7: memref<200x256xbf16, #tpu.memory_space<vmem>>, %arg8: memref<1x256xf32, #tpu.memory_space<vmem>>, %arg9: memref<256x200xbf16, #tpu.memory_space<vmem>>, %arg10: memref<1x200xf32, #tpu.memory_space<vmem>>, %arg11: memref<1x200xf32, #tpu.memory_space<vmem>>, %arg12: memref<1x200xf32, #tpu.memory_space<vmem>>, %arg13: memref<200x200xbf16, #tpu.memory_space<vmem>>, %arg14: memref<1x200xf32, #tpu.memory_space<vmem>>, %arg15: memref<200x200xbf16, #tpu.memory_space<vmem>>, %arg16: memref<1x200xf32, #tpu.memory_space<vmem>>, %arg17: memref<1x200xf32, #tpu.memory_space<vmem>>, %arg18: memref<1x200xf32, #tpu.memory_space<vmem>>, %arg19: memref<200x128xbf16, #tpu.memory_space<vmem>>, %arg20: memref<1x128xf32, #tpu.memory_space<vmem>>, %arg21: memref<16x128xf32, #tpu.memory_space<vmem>>) attributes {dimension_semantics = [], scalar_prefetch = 0 : i64, scratch_operands = 0 : i64, tpu.core_type = #tpu.core_type<tc>} {
    %c0 = arith.constant 0 : index
    %c0_0 = arith.constant 0 : index
    %0 = vector.load %arg0[%c0, %c0_0] : memref<16x200xf32, #tpu.memory_space<vmem>>, vector<16x200xf32>
    %c0_1 = arith.constant 0 : index
    %c0_2 = arith.constant 0 : index
    %1 = vector.load %arg1[%c0_1, %c0_2] : memref<16x200xf32, #tpu.memory_space<vmem>>, vector<16x200xf32>
    %2 = arith.addf %0, %1 : vector<16x200xf32>
    %c0_3 = arith.constant 0 : index
    %c0_4 = arith.constant 0 : index
    %3 = vector.load %arg2[%c0_3, %c0_4] : memref<8x8xf32, #tpu.memory_space<vmem>>, vector<8x8xf32>
    %4 = arith.truncf %2 : vector<16x200xf32> to vector<16x200xbf16>
    %c0_5 = arith.constant 0 : index
    %c0_6 = arith.constant 0 : index
    %5 = vector.load %arg3[%c0_5, %c0_6] : memref<200x256xbf16, #tpu.memory_space<vmem>>, vector<200x256xbf16>
    %cst = arith.constant dense<0.000000e+00> : vector<16x256xf32>
    %6 = tpu.matmul %4, %5, %cst {dimension_numbers = #tpu.dot_dimension_numbers<[1], [0], [0], [1], [0, 0, 1, 1], [], []>} : vector<16x200xbf16>, vector<200x256xbf16>, vector<16x256xf32> -> vector<16x256xf32>
    %c0_7 = arith.constant 0 : index
    %c0_8 = arith.constant 0 : index
    %7 = vector.load %arg4[%c0_7, %c0_8] : memref<1x256xf32, #tpu.memory_space<vmem>>, vector<1x256xf32>
    %8 = vector.broadcast %7 : vector<1x256xf32> to vector<16x256xf32>
    %9 = arith.addf %6, %8 : vector<16x256xf32>
    %c0_9 = arith.constant 0 : index
    %c0_10 = arith.constant 0 : index
    %10 = vector.load %arg5[%c0_9, %c0_10] : memref<200x256xbf16, #tpu.memory_space<vmem>>, vector<200x256xbf16>
    %cst_11 = arith.constant dense<0.000000e+00> : vector<16x256xf32>
    %11 = tpu.matmul %4, %10, %cst_11 {dimension_numbers = #tpu.dot_dimension_numbers<[1], [0], [0], [1], [0, 0, 1, 1], [], []>} : vector<16x200xbf16>, vector<200x256xbf16>, vector<16x256xf32> -> vector<16x256xf32>
    %c0_12 = arith.constant 0 : index
    %c0_13 = arith.constant 0 : index
    %12 = vector.load %arg6[%c0_12, %c0_13] : memref<1x256xf32, #tpu.memory_space<vmem>>, vector<1x256xf32>
    %13 = vector.broadcast %12 : vector<1x256xf32> to vector<16x256xf32>
    %14 = arith.addf %11, %13 : vector<16x256xf32>
    %c0_14 = arith.constant 0 : index
    %c0_15 = arith.constant 0 : index
    %15 = vector.load %arg7[%c0_14, %c0_15] : memref<200x256xbf16, #tpu.memory_space<vmem>>, vector<200x256xbf16>
    %cst_16 = arith.constant dense<0.000000e+00> : vector<16x256xf32>
    %16 = tpu.matmul %4, %15, %cst_16 {dimension_numbers = #tpu.dot_dimension_numbers<[1], [0], [0], [1], [0, 0, 1, 1], [], []>} : vector<16x200xbf16>, vector<200x256xbf16>, vector<16x256xf32> -> vector<16x256xf32>
    %c0_17 = arith.constant 0 : index
    %c0_18 = arith.constant 0 : index
    %17 = vector.load %arg8[%c0_17, %c0_18] : memref<1x256xf32, #tpu.memory_space<vmem>>, vector<1x256xf32>
    %18 = vector.broadcast %17 : vector<1x256xf32> to vector<16x256xf32>
    %19 = arith.addf %16, %18 : vector<16x256xf32>
    %20 = vector.extract_strided_slice %9 {offsets = [0, 0], sizes = [8, 128], strides = [1, 1]} : vector<16x256xf32> to vector<8x128xf32>
    %21 = arith.truncf %20 : vector<8x128xf32> to vector<8x128xbf16>
    %22 = vector.extract_strided_slice %14 {offsets = [0, 0], sizes = [8, 128], strides = [1, 1]} : vector<16x256xf32> to vector<8x128xf32>
    %23 = arith.truncf %22 : vector<8x128xf32> to vector<8x128xbf16>
    %24 = vector.extract_strided_slice %19 {offsets = [0, 0], sizes = [8, 128], strides = [1, 1]} : vector<16x256xf32> to vector<8x128xf32>
    %25 = arith.truncf %24 : vector<8x128xf32> to vector<8x128xbf16>
    %cst_19 = arith.constant dense<0.000000e+00> : vector<8x8xf32>
    %26 = tpu.matmul %21, %23, %cst_19 {dimension_numbers = #tpu.dot_dimension_numbers<[1], [1], [0], [0], [0, 0, 1, 0], [], []>} : vector<8x128xbf16>, vector<8x128xbf16>, vector<8x8xf32> -> vector<8x8xf32>
    %27 = arith.addf %26, %3 : vector<8x8xf32>
    %cst_20 = arith.constant dense<0xFF800000> : vector<8xf32>
    %28 = vector.multi_reduction <maximumf>, %27, %cst_20 [1] : vector<8x8xf32> to vector<8xf32>
    %29 = vector.shape_cast %28 : vector<8xf32> to vector<8x1xf32>
    %30 = vector.broadcast %29 : vector<8x1xf32> to vector<8x8xf32>
    %31 = arith.subf %27, %30 : vector<8x8xf32>
    %32 = math.exp %31 : vector<8x8xf32>
    %cst_21 = arith.constant dense<0.000000e+00> : vector<8xf32>
    %33 = vector.multi_reduction <add>, %32, %cst_21 [1] : vector<8x8xf32> to vector<8xf32>
    %34 = vector.shape_cast %33 : vector<8xf32> to vector<8x1xf32>
    %35 = tpu.reciprocal %34 {approx = true} : vector<8x1xf32> -> vector<8x1xf32>
    %36 = vector.broadcast %35 : vector<8x1xf32> to vector<8x8xf32>
    %37 = arith.mulf %32, %36 : vector<8x8xf32>
    %38 = arith.truncf %37 : vector<8x8xf32> to vector<8x8xbf16>
    %cst_22 = arith.constant dense<0.000000e+00> : vector<8x128xf32>
    %39 = tpu.matmul %38, %25, %cst_22 {dimension_numbers = #tpu.dot_dimension_numbers<[1], [0], [0], [1], [0, 0, 1, 1], [], []>} : vector<8x8xbf16>, vector<8x128xbf16>, vector<8x128xf32> -> vector<8x128xf32>
    %40 = vector.extract_strided_slice %9 {offsets = [0, 128], sizes = [8, 128], strides = [1, 1]} : vector<16x256xf32> to vector<8x128xf32>
    %41 = arith.truncf %40 : vector<8x128xf32> to vector<8x128xbf16>
    %42 = vector.extract_strided_slice %14 {offsets = [0, 128], sizes = [8, 128], strides = [1, 1]} : vector<16x256xf32> to vector<8x128xf32>
    %43 = arith.truncf %42 : vector<8x128xf32> to vector<8x128xbf16>
    %44 = vector.extract_strided_slice %19 {offsets = [0, 128], sizes = [8, 128], strides = [1, 1]} : vector<16x256xf32> to vector<8x128xf32>
    %45 = arith.truncf %44 : vector<8x128xf32> to vector<8x128xbf16>
    %cst_23 = arith.constant dense<0.000000e+00> : vector<8x8xf32>
    %46 = tpu.matmul %41, %43, %cst_23 {dimension_numbers = #tpu.dot_dimension_numbers<[1], [1], [0], [0], [0, 0, 1, 0], [], []>} : vector<8x128xbf16>, vector<8x128xbf16>, vector<8x8xf32> -> vector<8x8xf32>
    %47 = arith.addf %46, %3 : vector<8x8xf32>
    %cst_24 = arith.constant dense<0xFF800000> : vector<8xf32>
    %48 = vector.multi_reduction <maximumf>, %47, %cst_24 [1] : vector<8x8xf32> to vector<8xf32>
    %49 = vector.shape_cast %48 : vector<8xf32> to vector<8x1xf32>
    %50 = vector.broadcast %49 : vector<8x1xf32> to vector<8x8xf32>
    %51 = arith.subf %47, %50 : vector<8x8xf32>
    %52 = math.exp %51 : vector<8x8xf32>
    %cst_25 = arith.constant dense<0.000000e+00> : vector<8xf32>
    %53 = vector.multi_reduction <add>, %52, %cst_25 [1] : vector<8x8xf32> to vector<8xf32>
    %54 = vector.shape_cast %53 : vector<8xf32> to vector<8x1xf32>
    %55 = tpu.reciprocal %54 {approx = true} : vector<8x1xf32> -> vector<8x1xf32>
    %56 = vector.broadcast %55 : vector<8x1xf32> to vector<8x8xf32>
    %57 = arith.mulf %52, %56 : vector<8x8xf32>
    %58 = arith.truncf %57 : vector<8x8xf32> to vector<8x8xbf16>
    %cst_26 = arith.constant dense<0.000000e+00> : vector<8x128xf32>
    %59 = tpu.matmul %58, %45, %cst_26 {dimension_numbers = #tpu.dot_dimension_numbers<[1], [0], [0], [1], [0, 0, 1, 1], [], []>} : vector<8x8xbf16>, vector<8x128xbf16>, vector<8x128xf32> -> vector<8x128xf32>
    %60 = tpu.concatenate %39, %59 in 1 : vector<8x128xf32>, vector<8x128xf32> -> vector<8x256xf32>
    %61 = vector.extract_strided_slice %9 {offsets = [8, 0], sizes = [8, 128], strides = [1, 1]} : vector<16x256xf32> to vector<8x128xf32>
    %62 = arith.truncf %61 : vector<8x128xf32> to vector<8x128xbf16>
    %63 = vector.extract_strided_slice %14 {offsets = [8, 0], sizes = [8, 128], strides = [1, 1]} : vector<16x256xf32> to vector<8x128xf32>
    %64 = arith.truncf %63 : vector<8x128xf32> to vector<8x128xbf16>
    %65 = vector.extract_strided_slice %19 {offsets = [8, 0], sizes = [8, 128], strides = [1, 1]} : vector<16x256xf32> to vector<8x128xf32>
    %66 = arith.truncf %65 : vector<8x128xf32> to vector<8x128xbf16>
    %cst_27 = arith.constant dense<0.000000e+00> : vector<8x8xf32>
    %67 = tpu.matmul %62, %64, %cst_27 {dimension_numbers = #tpu.dot_dimension_numbers<[1], [1], [0], [0], [0, 0, 1, 0], [], []>} : vector<8x128xbf16>, vector<8x128xbf16>, vector<8x8xf32> -> vector<8x8xf32>
    %68 = arith.addf %67, %3 : vector<8x8xf32>
    %cst_28 = arith.constant dense<0xFF800000> : vector<8xf32>
    %69 = vector.multi_reduction <maximumf>, %68, %cst_28 [1] : vector<8x8xf32> to vector<8xf32>
    %70 = vector.shape_cast %69 : vector<8xf32> to vector<8x1xf32>
    %71 = vector.broadcast %70 : vector<8x1xf32> to vector<8x8xf32>
    %72 = arith.subf %68, %71 : vector<8x8xf32>
    %73 = math.exp %72 : vector<8x8xf32>
    %cst_29 = arith.constant dense<0.000000e+00> : vector<8xf32>
    %74 = vector.multi_reduction <add>, %73, %cst_29 [1] : vector<8x8xf32> to vector<8xf32>
    %75 = vector.shape_cast %74 : vector<8xf32> to vector<8x1xf32>
    %76 = tpu.reciprocal %75 {approx = true} : vector<8x1xf32> -> vector<8x1xf32>
    %77 = vector.broadcast %76 : vector<8x1xf32> to vector<8x8xf32>
    %78 = arith.mulf %73, %77 : vector<8x8xf32>
    %79 = arith.truncf %78 : vector<8x8xf32> to vector<8x8xbf16>
    %cst_30 = arith.constant dense<0.000000e+00> : vector<8x128xf32>
    %80 = tpu.matmul %79, %66, %cst_30 {dimension_numbers = #tpu.dot_dimension_numbers<[1], [0], [0], [1], [0, 0, 1, 1], [], []>} : vector<8x8xbf16>, vector<8x128xbf16>, vector<8x128xf32> -> vector<8x128xf32>
    %81 = vector.extract_strided_slice %9 {offsets = [8, 128], sizes = [8, 128], strides = [1, 1]} : vector<16x256xf32> to vector<8x128xf32>
    %82 = arith.truncf %81 : vector<8x128xf32> to vector<8x128xbf16>
    %83 = vector.extract_strided_slice %14 {offsets = [8, 128], sizes = [8, 128], strides = [1, 1]} : vector<16x256xf32> to vector<8x128xf32>
    %84 = arith.truncf %83 : vector<8x128xf32> to vector<8x128xbf16>
    %85 = vector.extract_strided_slice %19 {offsets = [8, 128], sizes = [8, 128], strides = [1, 1]} : vector<16x256xf32> to vector<8x128xf32>
    %86 = arith.truncf %85 : vector<8x128xf32> to vector<8x128xbf16>
    %cst_31 = arith.constant dense<0.000000e+00> : vector<8x8xf32>
    %87 = tpu.matmul %82, %84, %cst_31 {dimension_numbers = #tpu.dot_dimension_numbers<[1], [1], [0], [0], [0, 0, 1, 0], [], []>} : vector<8x128xbf16>, vector<8x128xbf16>, vector<8x8xf32> -> vector<8x8xf32>
    %88 = arith.addf %87, %3 : vector<8x8xf32>
    %cst_32 = arith.constant dense<0xFF800000> : vector<8xf32>
    %89 = vector.multi_reduction <maximumf>, %88, %cst_32 [1] : vector<8x8xf32> to vector<8xf32>
    %90 = vector.shape_cast %89 : vector<8xf32> to vector<8x1xf32>
    %91 = vector.broadcast %90 : vector<8x1xf32> to vector<8x8xf32>
    %92 = arith.subf %88, %91 : vector<8x8xf32>
    %93 = math.exp %92 : vector<8x8xf32>
    %cst_33 = arith.constant dense<0.000000e+00> : vector<8xf32>
    %94 = vector.multi_reduction <add>, %93, %cst_33 [1] : vector<8x8xf32> to vector<8xf32>
    %95 = vector.shape_cast %94 : vector<8xf32> to vector<8x1xf32>
    %96 = tpu.reciprocal %95 {approx = true} : vector<8x1xf32> -> vector<8x1xf32>
    %97 = vector.broadcast %96 : vector<8x1xf32> to vector<8x8xf32>
    %98 = arith.mulf %93, %97 : vector<8x8xf32>
    %99 = arith.truncf %98 : vector<8x8xf32> to vector<8x8xbf16>
    %cst_34 = arith.constant dense<0.000000e+00> : vector<8x128xf32>
    %100 = tpu.matmul %99, %86, %cst_34 {dimension_numbers = #tpu.dot_dimension_numbers<[1], [0], [0], [1], [0, 0, 1, 1], [], []>} : vector<8x8xbf16>, vector<8x128xbf16>, vector<8x128xf32> -> vector<8x128xf32>
    %101 = tpu.concatenate %80, %100 in 1 : vector<8x128xf32>, vector<8x128xf32> -> vector<8x256xf32>
    %102 = tpu.concatenate %60, %101 in 0 : vector<8x256xf32>, vector<8x256xf32> -> vector<16x256xf32>
    %103 = arith.truncf %102 : vector<16x256xf32> to vector<16x256xbf16>
    %c0_35 = arith.constant 0 : index
    %c0_36 = arith.constant 0 : index
    %104 = vector.load %arg9[%c0_35, %c0_36] : memref<256x200xbf16, #tpu.memory_space<vmem>>, vector<256x200xbf16>
    %cst_37 = arith.constant dense<0.000000e+00> : vector<16x200xf32>
    %105 = tpu.matmul %103, %104, %cst_37 {dimension_numbers = #tpu.dot_dimension_numbers<[1], [0], [0], [1], [0, 0, 1, 1], [], []>} : vector<16x256xbf16>, vector<256x200xbf16>, vector<16x200xf32> -> vector<16x200xf32>
    %c0_38 = arith.constant 0 : index
    %c0_39 = arith.constant 0 : index
    %106 = vector.load %arg10[%c0_38, %c0_39] : memref<1x200xf32, #tpu.memory_space<vmem>>, vector<1x200xf32>
    %107 = vector.broadcast %106 : vector<1x200xf32> to vector<16x200xf32>
    %108 = arith.addf %105, %107 : vector<16x200xf32>
    %109 = arith.addf %2, %108 : vector<16x200xf32>
    %c0_40 = arith.constant 0 : index
    %c0_41 = arith.constant 0 : index
    %110 = vector.load %arg11[%c0_40, %c0_41] : memref<1x200xf32, #tpu.memory_space<vmem>>, vector<1x200xf32>
    %c0_42 = arith.constant 0 : index
    %c0_43 = arith.constant 0 : index
    %111 = vector.load %arg12[%c0_42, %c0_43] : memref<1x200xf32, #tpu.memory_space<vmem>>, vector<1x200xf32>
    %cst_44 = arith.constant dense<0.000000e+00> : vector<16xf32>
    %112 = vector.multi_reduction <add>, %109, %cst_44 [1] : vector<16x200xf32> to vector<16xf32>
    %113 = vector.shape_cast %112 : vector<16xf32> to vector<16x1xf32>
    %cst_45 = arith.constant 2.000000e+02 : f32
    %114 = vector.broadcast %cst_45 : f32 to vector<16x1xf32>
    %115 = arith.divf %113, %114 : vector<16x1xf32>
    %116 = vector.broadcast %115 : vector<16x1xf32> to vector<16x200xf32>
    %117 = arith.subf %109, %116 : vector<16x200xf32>
    %118 = arith.mulf %117, %117 : vector<16x200xf32>
    %cst_46 = arith.constant dense<0.000000e+00> : vector<16xf32>
    %119 = vector.multi_reduction <add>, %118, %cst_46 [1] : vector<16x200xf32> to vector<16xf32>
    %120 = vector.shape_cast %119 : vector<16xf32> to vector<16x1xf32>
    %cst_47 = arith.constant 2.000000e+02 : f32
    %121 = vector.broadcast %cst_47 : f32 to vector<16x1xf32>
    %122 = arith.divf %120, %121 : vector<16x1xf32>
    %cst_48 = arith.constant 9.99999974E-6 : f32
    %123 = vector.broadcast %cst_48 : f32 to vector<16x1xf32>
    %124 = arith.addf %122, %123 : vector<16x1xf32>
    %125 = math.rsqrt %124 : vector<16x1xf32>
    %126 = vector.broadcast %125 : vector<16x1xf32> to vector<16x200xf32>
    %127 = arith.mulf %117, %126 : vector<16x200xf32>
    %128 = vector.broadcast %110 : vector<1x200xf32> to vector<16x200xf32>
    %129 = arith.mulf %127, %128 : vector<16x200xf32>
    %130 = vector.broadcast %111 : vector<1x200xf32> to vector<16x200xf32>
    %131 = arith.addf %129, %130 : vector<16x200xf32>
    %132 = arith.truncf %131 : vector<16x200xf32> to vector<16x200xbf16>
    %c0_49 = arith.constant 0 : index
    %c0_50 = arith.constant 0 : index
    %133 = vector.load %arg13[%c0_49, %c0_50] : memref<200x200xbf16, #tpu.memory_space<vmem>>, vector<200x200xbf16>
    %cst_51 = arith.constant dense<0.000000e+00> : vector<16x200xf32>
    %134 = tpu.matmul %132, %133, %cst_51 {dimension_numbers = #tpu.dot_dimension_numbers<[1], [0], [0], [1], [0, 0, 1, 1], [], []>} : vector<16x200xbf16>, vector<200x200xbf16>, vector<16x200xf32> -> vector<16x200xf32>
    %c0_52 = arith.constant 0 : index
    %c0_53 = arith.constant 0 : index
    %135 = vector.load %arg14[%c0_52, %c0_53] : memref<1x200xf32, #tpu.memory_space<vmem>>, vector<1x200xf32>
    %136 = vector.broadcast %135 : vector<1x200xf32> to vector<16x200xf32>
    %137 = arith.addf %134, %136 : vector<16x200xf32>
    %cst_54 = arith.constant 0.000000e+00 : f32
    %138 = vector.broadcast %cst_54 : f32 to vector<16x200xf32>
    %139 = arith.maximumf %137, %138 : vector<16x200xf32>
    %140 = arith.truncf %139 : vector<16x200xf32> to vector<16x200xbf16>
    %c0_55 = arith.constant 0 : index
    %c0_56 = arith.constant 0 : index
    %141 = vector.load %arg15[%c0_55, %c0_56] : memref<200x200xbf16, #tpu.memory_space<vmem>>, vector<200x200xbf16>
    %cst_57 = arith.constant dense<0.000000e+00> : vector<16x200xf32>
    %142 = tpu.matmul %140, %141, %cst_57 {dimension_numbers = #tpu.dot_dimension_numbers<[1], [0], [0], [1], [0, 0, 1, 1], [], []>} : vector<16x200xbf16>, vector<200x200xbf16>, vector<16x200xf32> -> vector<16x200xf32>
    %c0_58 = arith.constant 0 : index
    %c0_59 = arith.constant 0 : index
    %143 = vector.load %arg16[%c0_58, %c0_59] : memref<1x200xf32, #tpu.memory_space<vmem>>, vector<1x200xf32>
    %144 = vector.broadcast %143 : vector<1x200xf32> to vector<16x200xf32>
    %145 = arith.addf %142, %144 : vector<16x200xf32>
    %146 = arith.addf %131, %145 : vector<16x200xf32>
    %c0_60 = arith.constant 0 : index
    %c0_61 = arith.constant 0 : index
    %147 = vector.load %arg17[%c0_60, %c0_61] : memref<1x200xf32, #tpu.memory_space<vmem>>, vector<1x200xf32>
    %c0_62 = arith.constant 0 : index
    %c0_63 = arith.constant 0 : index
    %148 = vector.load %arg18[%c0_62, %c0_63] : memref<1x200xf32, #tpu.memory_space<vmem>>, vector<1x200xf32>
    %cst_64 = arith.constant dense<0.000000e+00> : vector<16xf32>
    %149 = vector.multi_reduction <add>, %146, %cst_64 [1] : vector<16x200xf32> to vector<16xf32>
    %150 = vector.shape_cast %149 : vector<16xf32> to vector<16x1xf32>
    %cst_65 = arith.constant 2.000000e+02 : f32
    %151 = vector.broadcast %cst_65 : f32 to vector<16x1xf32>
    %152 = arith.divf %150, %151 : vector<16x1xf32>
    %153 = vector.broadcast %152 : vector<16x1xf32> to vector<16x200xf32>
    %154 = arith.subf %146, %153 : vector<16x200xf32>
    %155 = arith.mulf %154, %154 : vector<16x200xf32>
    %cst_66 = arith.constant dense<0.000000e+00> : vector<16xf32>
    %156 = vector.multi_reduction <add>, %155, %cst_66 [1] : vector<16x200xf32> to vector<16xf32>
    %157 = vector.shape_cast %156 : vector<16xf32> to vector<16x1xf32>
    %cst_67 = arith.constant 2.000000e+02 : f32
    %158 = vector.broadcast %cst_67 : f32 to vector<16x1xf32>
    %159 = arith.divf %157, %158 : vector<16x1xf32>
    %cst_68 = arith.constant 9.99999974E-6 : f32
    %160 = vector.broadcast %cst_68 : f32 to vector<16x1xf32>
    %161 = arith.addf %159, %160 : vector<16x1xf32>
    %162 = math.rsqrt %161 : vector<16x1xf32>
    %163 = vector.broadcast %162 : vector<16x1xf32> to vector<16x200xf32>
    %164 = arith.mulf %154, %163 : vector<16x200xf32>
    %165 = vector.broadcast %147 : vector<1x200xf32> to vector<16x200xf32>
    %166 = arith.mulf %164, %165 : vector<16x200xf32>
    %167 = vector.broadcast %148 : vector<1x200xf32> to vector<16x200xf32>
    %168 = arith.addf %166, %167 : vector<16x200xf32>
    %169 = arith.truncf %168 : vector<16x200xf32> to vector<16x200xbf16>
    %c0_69 = arith.constant 0 : index
    %c0_70 = arith.constant 0 : index
    %170 = vector.load %arg19[%c0_69, %c0_70] : memref<200x128xbf16, #tpu.memory_space<vmem>>, vector<200x128xbf16>
    %cst_71 = arith.constant dense<0.000000e+00> : vector<16x128xf32>
    %171 = tpu.matmul %169, %170, %cst_71 {dimension_numbers = #tpu.dot_dimension_numbers<[1], [0], [0], [1], [0, 0, 1, 1], [], []>} : vector<16x200xbf16>, vector<200x128xbf16>, vector<16x128xf32> -> vector<16x128xf32>
    %c0_72 = arith.constant 0 : index
    %c0_73 = arith.constant 0 : index
    %172 = vector.load %arg20[%c0_72, %c0_73] : memref<1x128xf32, #tpu.memory_space<vmem>>, vector<1x128xf32>
    %173 = vector.broadcast %172 : vector<1x128xf32> to vector<16x128xf32>
    %174 = arith.addf %171, %173 : vector<16x128xf32>
    %c0_74 = arith.constant 0 : index
    %c0_75 = arith.constant 0 : index
    %175 = vector.load %arg21[%c0_74, %c0_75] : memref<16x128xf32, #tpu.memory_space<vmem>>, vector<16x128xf32>
    tpu.vector_store %arg21[%c0_74, %c0_75], %174 {strides = array<i32>} : memref<16x128xf32, #tpu.memory_space<vmem>>, vector<16x128xf32>,
    return
  }
}

</mosaic_0001>

<bundles_post_ra>
// kernel: transformer_forward.1
= control target key start
LH: loop header
LB: loop body
LE: loop exit
PB: predicated region body
PF: predicated region fallthrough
CT: control target
= control target key end

     0   :  { %vm246_vm0 = vcmask 588800   ;;  %vm250_vm1 = vcmask 1043456   ;;  %vm2653_vm2 = vmmov 0   ;;  %vm765_vm3 = vcmask 64512   ;;  %s3516_s5 = inlined_call_operand.vmem [shape: bf16[200,256], index: 5, kind: input, shape index: {}]   ;;  %s3517_s3 = inlined_call_operand.vmem [shape: bf16[200,256], index: 3, kind: input, shape index: {}]   ;;  %s3518_s0 = inlined_call_operand.vmem [shape: f32[16,200], index: 0, kind: input, shape index: {}]   ;;  %s3519_s1 = inlined_call_operand.vmem [shape: f32[16,200], index: 1, kind: input, shape index: {}]   ;;  %s3520_s6 = inlined_call_operand.vmem [shape: f32[1,256], index: 6, kind: input, shape index: {}]   ;;  %s3521_s4 = inlined_call_operand.vmem [shape: f32[1,256], index: 4, kind: input, shape index: {}]   ;;  %s3522_s7 = inlined_call_operand.vmem [shape: bf16[200,256], index: 7, kind: input, shape index: {}]   ;;  %s3523_s2 = inlined_call_operand.vmem [shape: f32[8,8], index: 2, kind: input, shape index: {}]   ;;  %s3524_s8 = inlined_call_operand.vmem [shape: f32[1,256], index: 8, kind: input, shape index: {}]   ;;  %s3525_s9 = inlined_call_operand.vmem [shape: bf16[256,200], index: 9, kind: input, shape index: {}]   ;;  %s3526_s10 = inlined_call_operand.vmem [shape: f32[1,200], index: 10, kind: input, shape index: {}]   ;;  %s3527_s13 = inlined_call_operand.vmem [shape: bf16[200,200], index: 13, kind: input, shape index: {}]   ;;  %s3528_s15 = inlined_call_operand.vmem [shape: bf16[200,200], index: 15, kind: input, shape index: {}]   ;;  %s3529_s11 = inlined_call_operand.vmem [shape: f32[1,200], index: 11, kind: input, shape index: {}]   ;;  %s3530_s12 = inlined_call_operand.vmem [shape: f32[1,200], index: 12, kind: input, shape index: {}]   ;;  %s3531_s14 = inlined_call_operand.vmem [shape: f32[1,200], index: 14, kind: input, shape index: {}]   ;;  %s3532_s16 = inlined_call_operand.vmem [shape: f32[1,200], index: 16, kind: input, shape index: {}]   ;;  %s3533_s19 = inlined_call_operand.vmem [shape: bf16[200,128], index: 19, kind: input, shape index: {}]   ;;  %s3534_s17 = inlined_call_operand.vmem [shape: f32[1,200], index: 17, kind: input, shape index: {}]   ;;  %s3535_s18 = inlined_call_operand.vmem [shape: f32[1,200], index: 18, kind: input, shape index: {}]   ;;  %s3536_s20 = inlined_call_operand.vmem [shape: f32[1,128], index: 20, kind: input, shape index: {}]   ;;  %s3537_s21 = inlined_call_operand.vmem [shape: f32[16,128], index: 21, kind: output, shape index: {}]  }
   0x1   :  { %3542 = sst [smem:[#allocation2_spill]] %s3516_s5 }
   0x2   :  { %3543 = sst [smem:[#allocation3_spill]] %s3517_s3  ;;  %s3548_s26 = sld [smem:[#allocation2_spill]] }
   0x3   :  { %3544 = sst [smem:[#allocation4_spill]] %s3518_s0  ;;  %s3549_s30 = sld [smem:[#allocation3_spill]] }
   0x4   :  { %3545 = sst [smem:[#allocation5_spill]] %s3519_s1  ;;  %s3550_s22 = sld [smem:[#allocation4_spill]] }
   0x5   :  { %3546 = sst [smem:[#allocation6_spill]] %s3520_s6  ;;  %s3551_s25 = sld [smem:[#allocation5_spill]] }
   0x6   :  { %3547 = sst [smem:[#allocation7_spill]] %s3521_s4 }
   0x7   :  { %s3553_s4 = sld [smem:[#allocation7_spill]] }
   0x8   :  { %v2377_v0 = vld [vmem:[%s3548_s26 + $0x4] ss:$8 sps:$4 sm:$0xff]   ;;  %v2379_v1 = vld [vmem:[%s3548_s26] ss:$8 sps:$4 sm:$0xff]   ;;  %v2380_v2 = vld [vmem:[%s3548_s26 + $0x14] ss:$8 sps:$4 sm:$0xff]  }
   0x9   :  { %468 = vmatprep.subr.bf16.mxu1 %v2377_v0  ;;  %v2382_v3 = vld [vmem:[%s3549_s30 + $0x4] ss:$8 sps:$4 sm:$0xff]   ;;  %v2384_v4 = vld [vmem:[%s3548_s26 + $0x10] ss:$8 sps:$4 sm:$0xff]   ;;  %v2385_v5 = vld [vmem:[%s3549_s30] ss:$8 sps:$4 sm:$0xff]  }
   0xa   :  { %469 = vmatpush1.bf16.msra.mxu1 %v2379_v1  ;;  %v2386_v6 = vld [vmem:[%s3548_s26 + $0x24] ss:$8 sps:$4 sm:$0xff]   ;;  %257 = vmatprep.subr.bf16.mxu0 %v2382_v3  ;;  %v2388_v7 = vld [vmem:[%s3549_s30 + $0x14] ss:$8 sps:$4 sm:$0xff]   ;;  %v2391_v8 = vld [vmem:[%s3549_s30 + $0x10] ss:$8 sps:$4 sm:$0xff]  }
   0xb   :  { %470 = vmatprep.subr.bf16.mxu1 %v2380_v2  ;;  %258 = vmatpush1.bf16.msra.mxu0 %v2385_v5  ;;  %v2390_v9 = vld [vmem:[%s3548_s26 + $0x20] ss:$8 sps:$4 sm:$0xff]   ;;  %v2392_v10 = vld [vmem:[%s3548_s26 + $0x34] ss:$8 sps:$4 sm:$0xff]   ;;  %v2394_v11 = vld [vmem:[%s3549_s30 + $0x24] ss:$8 sps:$4 sm:$0xff]  }
   0xc   :  { %259 = vmatprep.subr.bf16.mxu0 %v2388_v7  ;;  %v2397_v12 = vld [vmem:[%s3549_s30 + $0x20] ss:$8 sps:$4 sm:$0xff]   ;;  %v2396_v13 = vld [vmem:[%s3548_s26 + $0x30] ss:$8 sps:$4 sm:$0xff]   ;;  %v2400_v14 = vld [vmem:[%s3549_s30 + $0x34] ss:$8 sps:$4 sm:$0xff]   ;;  %v111_v7 = vlaneseq }
   0xd   :  { %v2398_v15 = vld [vmem:[%s3548_s26 + $0x44] ss:$8 sps:$4 sm:$0xff]   ;;  %v2402_v16 = vld [vmem:[%s3548_s26 + $0x40] ss:$8 sps:$4 sm:$0xff]   ;;  %v2403_v17 = vld [vmem:[%s3549_s30 + $0x30] ss:$8 sps:$4 sm:$0xff]  }
   0xe   :  { %471 = vmatpush1.bf16.msra.mxu1 %v2384_v4  ;;  %v2406_v18 = vld [vmem:[%s3549_s30 + $0x44] ss:$8 sps:$4 sm:$0xff]   ;;  %v2404_v19 = vld [vmem:[%s3548_s26 + $0x54] ss:$8 sps:$4 sm:$0xff]   ;;  %v2409_v20 = vld [vmem:[%s3549_s30 + $0x40] ss:$8 sps:$4 sm:$0xff]  }
   0xf   :  { %472 = vmatprep.subr.bf16.mxu1 %v2386_v6  ;;  %260 = vmatpush1.bf16.msra.mxu0 %v2391_v8  ;;  %v2408_v21 = vld [vmem:[%s3548_s26 + $0x50] ss:$8 sps:$4 sm:$0xff]   ;;  %v2412_v22 = vld [vmem:[%s3549_s30 + $0x54] ss:$8 sps:$4 sm:$0xff]   ;;  %v2410_v23 = vld [vmem:[%s3548_s26 + $0x64] ss:$8 sps:$4 sm:$0xff]  }
  0x10   :  { %261 = vmatprep.subr.bf16.mxu0 %v2394_v11  ;;  %v2414_v24 = vld [vmem:[%s3548_s26 + $0x60] ss:$8 sps:$4 sm:$0xff]   ;;  %v2415_v25 = vld [vmem:[%s3549_s30 + $0x50] ss:$8 sps:$4 sm:$0xff]   ;;  %v2418_v26 = vld [vmem:[%s3549_s30 + $0x64] ss:$8 sps:$4 sm:$0xff]  }
  0x11   :  { %v2416_v27 = vld [vmem:[%s3548_s26 + $0x74] ss:$8 sps:$4 sm:$0xff]   ;;  %v2421_v28 = vld [vmem:[%s3549_s30 + $0x60] ss:$8 sps:$4 sm:$0xff]   ;;  %v2420_v29 = vld [vmem:[%s3548_s26 + $0x70] ss:$8 sps:$4 sm:$0xff]  }
  0x12   :  { %473 = vmatpush1.bf16.msra.mxu1 %v2390_v9  ;;  %v2424_v30 = vld [vmem:[%s3549_s30 + $0x74] ss:$8 sps:$4 sm:$0xff]   ;;  %v2422_v31 = vld [vmem:[%s3548_s26 + $0x84] ss:$8 sps:$4 sm:$0xff]   ;;  %v2426_v32 = vld [vmem:[%s3548_s26 + $0x80] ss:$8 sps:$4 sm:$0xff]  }
  0x13   :  { %474 = vmatprep.subr.bf16.mxu1 %v2392_v10  ;;  %262 = vmatpush1.bf16.msra.mxu0 %v2397_v12  ;;  %v2427_v33 = vld [vmem:[%s3549_s30 + $0x70] ss:$8 sps:$4 sm:$0xff]   ;;  %v2430_v34 = vld [vmem:[%s3549_s30 + $0x84] ss:$8 sps:$4 sm:$0xff]   ;;  %v2428_v35 = vld [vmem:[%s3548_s26 + $0x94] ss:$8 sps:$4 sm:$0xff]  }
  0x14   :  { %263 = vmatprep.subr.bf16.mxu0 %v2400_v14  ;;  %v70_v36 = vld [vmem:[%s3550_s22 + $0x8] sm:$0xff]  ;;  %v72_v37 = vld [vmem:[%s3550_s22 + $0x18] sm:$0xff]  ;;  %v324_v52 = vld [vmem:[%s3548_s26 + $0xc0] sm:$0xff]  ;;  %v2652_v6 = vmov 0.0   ;;  %v112_v8 = vshrl.u32 %v111_v7, 7 }
  0x15   :  { %v74_v38 = vld [vmem:[%s3551_s25 + $0x8] sm:$0xff]  ;;  %v76_v39 = vld [vmem:[%s3551_s25 + $0x18] sm:$0xff]  ;;  %v69_v55 = vld [vmem:[%s3550_s22] sm:$0xff]  ;;  %v2172_v59 = vcombine.high %v324_v52, %v324_v52  ;;  %v2171_v60 = vcombine.low %v324_v52, %v324_v52 }
  0x16   :  { %475 = vmatpush1.bf16.msra.mxu1 %v2396_v13  ;;  %v2433_v40 = vld [vmem:[%s3549_s30 + $0x80] ss:$8 sps:$4 sm:$0xff]   ;;  %v2888_v41 = vadd.f32 %v74_v38, %v70_v36  ;;  %v2890_v42 = vadd.f32 %v76_v39, %v72_v37  ;;  %v2432_v43 = vld [vmem:[%s3548_s26 + $0x90] ss:$8 sps:$4 sm:$0xff]   ;;  %v2436_v44 = vld [vmem:[%s3549_s30 + $0x94] ss:$8 sps:$4 sm:$0xff]  }
  0x17   :  { %476 = vmatprep.subr.bf16.mxu1 %v2398_v15  ;;  %264 = vmatpush1.bf16.msra.mxu0 %v2403_v17  ;;  %v2434_v45 = vld [vmem:[%s3548_s26 + $0xa4] ss:$8 sps:$4 sm:$0xff]   ;;  %v2439_v47 = vld [vmem:[%s3549_s30 + $0x90] ss:$8 sps:$4 sm:$0xff]   ;;  %v2438_v48 = vld [vmem:[%s3548_s26 + $0xa0] ss:$8 sps:$4 sm:$0xff]  }
  0x18   :  { %265 = vmatprep.subr.bf16.mxu0 %v2406_v18  ;;  %v83_v46 = vpack.c.bf16 %v2890_v42, %v2888_v41  ;;  %v2442_v49 = vld [vmem:[%s3549_s30 + $0xa4] ss:$8 sps:$4 sm:$0xff]   ;;  %v2440_v50 = vld [vmem:[%s3548_s26 + $0xb4] ss:$8 sps:$4 sm:$0xff]   ;;  %v2444_v51 = vld [vmem:[%s3548_s26 + $0xb0] ss:$8 sps:$4 sm:$0xff]  }
  0x19   :  { %v2445_v53 = vld [vmem:[%s3549_s30 + $0xa0] ss:$8 sps:$4 sm:$0xff]   ;;  %v2447_v54 = vld [vmem:[%s3549_s30 + $0xb4] ss:$8 sps:$4 sm:$0xff]   ;;  %v2450_v62 = vld [vmem:[%s3549_s30 + $0xb0] ss:$8 sps:$4 sm:$0xff]  }
  0x1a   :  { %477 = vmatpush1.bf16.msra.mxu1 %v2402_v16  ;;  %2174 = vmatprep.mubr.msk.bf16.mxu1 %vm246_vm0, %v83_v46  ;;  %v71_v56 = vld [vmem:[%s3550_s22 + $0x10] sm:$0xff]  ;;  %v73_v57 = vld [vmem:[%s3551_s25] sm:$0xff]  ;;  %v463_v3 = vsel %vm250_vm1, %v2171_v60, 0  ;;  %v2965_v9 = vsub.s32 0, %v112_v8  ;;  %v2974_v13 = vsub.s32 1, %v112_v8 }
  0x1b   :  { %478 = vmatprep.subr.bf16.mxu1 %v2404_v19  ;;  %266 = vmatpush1.bf16.msra.mxu0 %v2409_v20  ;;  %v75_v58 = vld [vmem:[%s3551_s25 + $0x10] sm:$0xff]  ;;  %v108_v61 = vld [vmem:[%s3549_s30 + $0xc0] sm:$0xff]  ;;  %v2947_v63 = vadd.f32 %v73_v57, %v69_v55  ;;  %s3552_s25 = sld [smem:[#allocation6_spill]] }
  0x1c   :  { %267 = vmatprep.subr.bf16.mxu0 %v2412_v22  ;;  %2146 = vmatprep.mubr.msk.bf16.mxu0 %vm246_vm0, %v83_v46  ;;  %v2949_v0 = vadd.f32 %v75_v58, %v71_v56  ;;  %v2144_v1 = vcombine.high %v108_v61, %v108_v61  ;;  %v2143_v2 = vcombine.low %v108_v61, %v108_v61  ;;  %v109_v12 = vld [vmem:[%s3553_s4] sm:$0x3]  ;;  %v2458_v36 = vld [vmem:[%s3522_s7 + $0x14] ss:$8 sps:$4 sm:$0xff]   ;;  %v2456_v37 = vld [vmem:[%s3522_s7 + $0x10] ss:$8 sps:$4 sm:$0xff]  }
  0x1d   :  { %v114_v15 = vrot.slane %v109_v12, %v2965_v9  ;;  %v118_v18 = vrot.slane %v109_v12, %v2974_v13  ;;  %v2461_v38 = vld [vmem:[%s3522_s7 + $0x24] ss:$8 sps:$4 sm:$0xff]   ;;  %v2459_v39 = vld [vmem:[%s3522_s7 + $0x20] ss:$8 sps:$4 sm:$0xff]   ;;  %v2480_v55 = vld [vmem:[%s3522_s7 + $0x90] ss:$8 sps:$4 sm:$0xff]  }
  0x1e   :  { %479 = vmatpush1.bf16.msra.mxu1 %v2408_v21  ;;  %v2955_v4 = vpack.c.bf16 %v2949_v0, %v2947_v63  ;;  %v252_v5 = vsel %vm250_vm1, %v2143_v2, 0  ;;  %v2479_v52 = vld [vmem:[%s3522_s7 + $0x84] ss:$8 sps:$4 sm:$0xff]   ;;  %v2483_v57 = vld [vmem:[%s3522_s7 + $0xa0] ss:$8 sps:$4 sm:$0xff]  }
  0x1f   :  { %480 = vmatprep.subr.bf16.mxu1 %v2410_v23  ;;  %268 = vmatpush1.bf16.msra.mxu0 %v2415_v25  ;;  %v2485_v56 = vld [vmem:[%s3522_s7 + $0xa4] ss:$8 sps:$4 sm:$0xff]   ;;  %v2488_v58 = vld [vmem:[%s3522_s7 + $0xb4] ss:$8 sps:$4 sm:$0xff]   ;;  %v2486_v60 = vld [vmem:[%s3522_s7 + $0xb0] ss:$8 sps:$4 sm:$0xff]  }
  0x20   :  { %269 = vmatprep.subr.bf16.mxu0 %v2418_v26  ;;  %v3081_v2 = vld [vmem:[%s3523_s2] sm:$0xff] }
  0x21   :  { %v325_v10 = vld [vmem:[%s3552_s25] sm:$0x3] }
  0x22   :  { %481 = vmatpush1.bf16.msra.mxu1 %v2414_v24  ;;  %v330_v11 = vrot.slane %v325_v10, %v2965_v9  ;;  %v2981_v19 = vrot.slane %v325_v10, %v2974_v13 }
  0x23   :  { %482 = vmatprep.subr.bf16.mxu1 %v2416_v27  ;;  %270 = vmatpush1.bf16.msra.mxu0 %v2421_v28 }
  0x24   :  { %271 = vmatprep.subr.bf16.mxu0 %v2424_v30 }
  0x26   :  { %483 = vmatpush1.bf16.msra.mxu1 %v2420_v29 }
  0x27   :  { %484 = vmatprep.subr.bf16.mxu1 %v2422_v31  ;;  %272 = vmatpush1.bf16.msra.mxu0 %v2427_v33 }
  0x28   :  { %273 = vmatprep.subr.bf16.mxu0 %v2430_v34  ;;  %v2453_v34 = vld [vmem:[%s3522_s7] ss:$8 sps:$4 sm:$0xff]  }
  0x2a   :  { %485 = vmatpush1.bf16.msra.mxu1 %v2426_v32 }
  0x2b   :  { %486 = vmatprep.subr.bf16.mxu1 %v2428_v35  ;;  %274 = vmatpush1.bf16.msra.mxu0 %v2433_v40  ;;  %v2455_v35 = vld [vmem:[%s3522_s7 + $0x4] ss:$8 sps:$4 sm:$0xff]   ;;  %v2464_v40 = vld [vmem:[%s3522_s7 + $0x34] ss:$8 sps:$4 sm:$0xff]  }
  0x2c   :  { %275 = vmatprep.subr.bf16.mxu0 %v2436_v44  ;;  %v2467_v44 = vld [vmem:[%s3522_s7 + $0x44] ss:$8 sps:$4 sm:$0xff]  }
  0x2e   :  { %487 = vmatpush1.bf16.msra.mxu1 %v2432_v43  ;;  %v2462_v43 = vld [vmem:[%s3522_s7 + $0x30] ss:$8 sps:$4 sm:$0xff]  }
  0x2f   :  { %488 = vmatprep.subr.bf16.mxu1 %v2434_v45  ;;  %276 = vmatpush1.bf16.msra.mxu0 %v2439_v47  ;;  %v2465_v45 = vld [vmem:[%s3522_s7 + $0x40] ss:$8 sps:$4 sm:$0xff]   ;;  %v2468_v47 = vld [vmem:[%s3522_s7 + $0x50] ss:$8 sps:$4 sm:$0xff]  }
  0x30   :  { %277 = vmatprep.subr.bf16.mxu0 %v2442_v49  ;;  %v2471_v49 = vld [vmem:[%s3522_s7 + $0x60] ss:$8 sps:$4 sm:$0xff]  }
  0x32   :  { %489 = vmatpush1.bf16.msra.mxu1 %v2438_v48  ;;  %v2473_v48 = vld [vmem:[%s3522_s7 + $0x64] ss:$8 sps:$4 sm:$0xff]  }
  0x33   :  { %490 = vmatprep.subr.bf16.mxu1 %v2440_v50  ;;  %278 = vmatpush1.bf16.msra.mxu0 %v2445_v53  ;;  %v2476_v50 = vld [vmem:[%s3522_s7 + $0x74] ss:$8 sps:$4 sm:$0xff]   ;;  %v2477_v53 = vld [vmem:[%s3522_s7 + $0x80] ss:$8 sps:$4 sm:$0xff]  }
  0x34   :  { %279 = vmatprep.subr.bf16.mxu0 %v2447_v54  ;;  %v2482_v54 = vld [vmem:[%s3522_s7 + $0x94] ss:$8 sps:$4 sm:$0xff]  }
  0x36   :  { %491 = vmatpush1.bf16.msra.mxu1 %v2444_v51  ;;  %v2474_v51 = vld [vmem:[%s3522_s7 + $0x70] ss:$8 sps:$4 sm:$0xff]  }
  0x37   :  { %2173 = vmatprep.subr.msk.bf16.mxu1 %vm250_vm1, %v2172_v59  ;;  %280 = vmatpush1.bf16.msra.mxu0 %v2450_v62  ;;  %v535_v59 = vld [vmem:[%s3522_s7 + $0xc0] sm:$0xff] }
  0x38   :  { %2145 = vmatprep.subr.msk.bf16.mxu0 %vm250_vm1, %v2144_v1  ;;  %v2200_v61 = vcombine.high %v535_v59, %v535_v59  ;;  %v2199_v62 = vcombine.low %v535_v59, %v535_v59 }
  0x3a   :  { %493 = vmatpush1.bf16.msra.mxu1 %v463_v3  ;;  %v674_v1 = vsel %vm250_vm1, %v2199_v62, 0 }
  0x3b   :  { %282 = vmatpush1.bf16.msra.mxu0 %v252_v5  ;;  %2326 = vmatprep.subr.bf16.mxu1 %v2652_v6 }
  0x3c   :  { %679 = vmatprep.subr.bf16.mxu0 %v2455_v35 }
  0x3d   :  { %501 = vmatmul.mubr.bf16.vlgmr.msra.gmra.mrb[0].mxu1 %v2955_v4 }
  0x3e   :  { %290 = vmatmul.mubr.bf16.vlgmr.msra.gmra.mrb[0].mxu0 %v2955_v4  ;;  %2328 = vmatprep.mubr.msk.bf16.mxu1 %vm2653_vm2, %v2652_v6 }
  0x3f   :  { %2202 = vmatprep.mubr.msk.bf16.mxu0 %vm246_vm0, %v83_v46  ;;  %680 = vmatpush1.bf16.msra.mxu0 %v2453_v34  ;;  %v2470_v46 = vld [vmem:[%s3522_s7 + $0x54] ss:$8 sps:$4 sm:$0xff]  }
  0x40   :  { %681 = vmatprep.subr.bf16.mxu0 %v2458_v36 }
  0x43   :  { %682 = vmatpush1.bf16.msra.mxu0 %v2456_v37 }
  0x44   :  { %683 = vmatprep.subr.bf16.mxu0 %v2461_v38 }
  0x47   :  { %684 = vmatpush1.bf16.msra.mxu0 %v2459_v39 }
  0x48   :  { %685 = vmatprep.subr.bf16.mxu0 %v2464_v40 }
  0x4b   :  { %686 = vmatpush1.bf16.msra.mxu0 %v2462_v43 }
  0x4c   :  { %687 = vmatprep.subr.bf16.mxu0 %v2467_v44 }
  0x4f   :  { %688 = vmatpush1.bf16.msra.mxu0 %v2465_v45 }
  0x50   :  { %689 = vmatprep.subr.bf16.mxu0 %v2470_v46 }
  0x53   :  { %690 = vmatpush1.bf16.msra.mxu0 %v2468_v47 }
  0x54   :  { %691 = vmatprep.subr.bf16.mxu0 %v2473_v48 }
  0x57   :  { %692 = vmatpush1.bf16.msra.mxu0 %v2471_v49 }
  0x58   :  { %693 = vmatprep.subr.bf16.mxu0 %v2476_v50 }
  0x5b   :  { %694 = vmatpush1.bf16.msra.mxu0 %v2474_v51 }
  0x5c   :  { %695 = vmatprep.subr.bf16.mxu0 %v2479_v52 }
  0x5f   :  { %696 = vmatpush1.bf16.msra.mxu0 %v2477_v53 }
  0x60   :  { %697 = vmatprep.subr.bf16.mxu0 %v2482_v54 }
  0x63   :  { %698 = vmatpush1.bf16.msra.mxu0 %v2480_v55 }
  0x64   :  { %699 = vmatprep.subr.bf16.mxu0 %v2485_v56 }
  0x67   :  { %700 = vmatpush1.bf16.msra.mxu0 %v2483_v57 }
  0x68   :  { %701 = vmatprep.subr.bf16.mxu0 %v2488_v58 }
  0x6b   :  { %702 = vmatpush1.bf16.msra.mxu0 %v2486_v60 }
  0x6c   :  { %2201 = vmatprep.subr.msk.bf16.mxu0 %vm250_vm1, %v2200_v61 }
  0x6f   :  { %704 = vmatpush1.bf16.msra.mxu0 %v674_v1 }
  0x70   :  { %2368 = vmatprep.subr.bf16.mxu0 %v2652_v6 }
  0x72   :  { %712 = vmatmul.mubr.bf16.vlgmr.msra.gmra.mrb[4].mxu0 %v2955_v4  ;;  %v536_v4 = vld [vmem:[%s3524_s8] sm:$0x3] }
  0x73   :  { %2370 = vmatprep.mubr.msk.bf16.mxu0 %vm2653_vm2, %v2652_v6  ;;  %v541_v12 = vrot.slane %v536_v4, %v2965_v9 }
 0x110   :  { %v502_v14 = vpop.f32.mrb[0].mxu1 }
 0x111   :  { %v503_v16 = vadd.f32 %v502_v14, %v330_v11  ;;  %v2977_v17 = vpop.f32.mrb[1].mxu1  ;;  %v291_v24 = vpop.f32.mrb[0].mxu0  ;;  %v545_v14 = vrot.slane %v536_v4, %v2974_v13 }
 0x112   :  { %v506_v20 = vpop.f32.mrb[2].mxu1  ;;  %v292_v26 = vadd.f32 %v291_v24, %v114_v15  ;;  %v293_v27 = vpop.f32.mrb[1].mxu0  ;;  %v505_v43 = vadd.f32 %v2977_v17, %v2981_v19 }
 0x113   :  { %v723_v21 = vpack.c.bf16 %v503_v16, %v503_v16  ;;  %v2983_v22 = vadd.f32 %v506_v20, %v330_v11  ;;  %v508_v23 = vpop.f32.mrb[3].mxu1  ;;  %v2988_v28 = vadd.f32 %v293_v27, %v118_v18  ;;  %v295_v29 = vpop.f32.mrb[2].mxu0 }
 0x114   :  { %v2986_v25 = vadd.f32 %v508_v23, %v2981_v19  ;;  %v2990_v30 = vadd.f32 %v295_v29, %v114_v15  ;;  %v297_v31 = vpop.f32.mrb[3].mxu0  ;;  %v722_v33 = vpack.c.bf16 %v292_v26, %v292_v26  ;;  %v825_v46 = vpack.c.bf16 %v505_v43, %v505_v43 }
 0x115   :  { %2327 = vmatpush3.bf16.xpose.msra.mxu1 %v723_v21  ;;  %v2993_v32 = vadd.f32 %v297_v31, %v118_v18  ;;  %v824_v48 = vpack.c.bf16 %v2988_v28, %v2988_v28 }
 0x116   :  { %2332 = vmatprep.subr.bf16.mxu1 %v2652_v6 }
 0x11c   :  { %2329 = vmatmul.mubr.bf16.vlgmr.msra.gmra.mrb[4].mxu1 %v722_v33 }
 0x11d   :  { %2334 = vmatprep.mubr.msk.bf16.mxu1 %vm2653_vm2, %v2652_v6 }
 0x145   :  { %v713_v15 = vpop.f32.mrb[4].mxu0 }
 0x146   :  { %v714_v16 = vadd.f32 %v713_v15, %v541_v12  ;;  %v715_v18 = vpop.f32.mrb[5].mxu0 }
 0x147   :  { %v716_v21 = vadd.f32 %v715_v18, %v545_v14  ;;  %v717_v33 = vpop.f32.mrb[6].mxu0 }
 0x148   :  { %v724_v24 = vpack.c.bf16 %v714_v16, %v714_v16  ;;  %v719_v34 = vpop.f32.mrb[7].mxu0  ;;  %v718_v35 = vadd.f32 %v717_v33, %v541_v12 }
 0x149   :  { %v720_v36 = vadd.f32 %v719_v34, %v545_v14  ;;  %v826_v47 = vpack.c.bf16 %v716_v21, %v716_v21 }
 0x14a   :  { %v782_v27 = vsel %vm250_vm1, %v724_v24, 0 }
 0x14b   :  { %2333 = vmatpush3.bf16.msra.mxu1 %v782_v27  ;;  %v1028_v37 = vpack.c.bf16 %v720_v36, %v720_v36  ;;  %v883_v49 = vsel %vm250_vm1, %v826_v47, 0  ;;  %v1027_v36 = vpack.c.bf16 %v2986_v25, %v2986_v25 }
 0x14c   :  { %2338 = vmatprep.subr.bf16.mxu1 %v2652_v6 }
 0x14d   :  { %v1085_v38 = vsel %vm250_vm1, %v1028_v37, 0  ;;  %v1026_v37 = vpack.c.bf16 %v2993_v32, %v2993_v32 }
 0x14e   :  { %2369 = vmatpush3.bf16.msra.mxu0 %v1085_v38 }
 0x1ef   :  { %v759_v3 = vpop.f32.mrb[4].mxu1 }
 0x1f0   :  { %v760_v5 = vadd.f32 %v759_v3, %v3081_v2  ;;  %v2330_v7 = vpop.f32.mrb[5].mxu1 }
 0x1f1   :  { %v762_v8 = vpop.f32.mrb[6].mxu1  ;;  %v926_v7 = vpack.c.bf16 %v2983_v22, %v2983_v22 }
 0x1f2   :  { %v2331_v10 = vpop.f32.mrb[7].mxu1  ;;  %v766_v11 = vsel %vm765_vm3, %v760_v5, -inf  ;;  %v927_v8 = vpack.c.bf16 %v718_v35, %v718_v35 }
 0x1f3   :  { %767 = vmax.xlane.f32.xlu0 %v766_v11  ;;  %v925_v10 = vpack.c.bf16 %v2990_v30, %v2990_v30 }
 0x1f4   :  { %v984_v11 = vsel %vm250_vm1, %v927_v8, 0  ;;  %v2515_v8 = vld [vmem:[%s3525_s9 + $0x80] ss:$8 sps:$4 sm:$0xff]  }
 0x280   :  { %v768_v20 = vpop.xlane.xlu0 %767 }
 0x281   :  { %v769_v23 = vsub.f32 %v760_v5, %v768_v20 }
 0x283   :  { %v770_v26 = vmul.f32 1.442695, %v769_v23 }
 0x285   :  { %2628 = vpow2.f32 %v770_v26 }
 0x28f   :  { %v2629_v29 = vpop.eup %2628 }
 0x290   :  { %v772_v31 = vsel %vm765_vm3, %v2629_v29, 0.0 }
 0x291   :  { %773 = vadd.xlane.f32.xlu0 %v772_v31 }
 0x31e   :  { %v774_v39 = vpop.xlane.xlu0 %773 }
 0x31f   :  { %2630 = vrcp.f32 %v774_v39 }
 0x329   :  { %v2631_v40 = vpop.eup %2630 }
 0x32a   :  { %v776_v44 = vmul.f32 %v2631_v40, %v2629_v29 }
 0x32c   :  { %v777_v45 = vpack.c.bf16 %v776_v44, %v776_v44 }
 0x32e   :  { %2335 = vmatmul.mubr.msk.bf16.vlgmr.msra.gmra.mrb[8].mxu1 %vm765_vm3, %v777_v45 }
 0x32f   :  { %2339 = vmatpush3.bf16.xpose.msra.mxu1 %v825_v46  ;;  %2340 = vmatprep.mubr.msk.bf16.mxu1 %vm2653_vm2, %v2652_v6 }
 0x330   :  { %2344 = vmatprep.subr.bf16.mxu1 %v2652_v6 }
 0x336   :  { %2341 = vmatmul.mubr.bf16.vlgmr.msra.gmra.mrb[12].mxu1 %v824_v48 }
 0x337   :  { %2345 = vmatpush3.bf16.msra.mxu1 %v883_v49  ;;  %2346 = vmatprep.mubr.msk.bf16.mxu1 %vm2653_vm2, %v2652_v6 }
 0x338   :  { %2350 = vmatprep.subr.bf16.mxu1 %v2652_v6 }
 0x401   :  { %v3106_v17 = vpop.f32.mrb[8].mxu1 }
 0x402   :  { %v2336_v19 = vpop.f32.mrb[9].mxu1 }
 0x403   :  { %v821_v50 = vpop.f32.mrb[10].mxu1 }
 0x404   :  { %v2337_v51 = vpop.f32.mrb[11].mxu1 }
 0x409   :  { %v861_v52 = vpop.f32.mrb[12].mxu1 }
 0x40a   :  { %v862_v53 = vadd.f32 %v861_v52, %v3081_v2  ;;  %v2342_v54 = vpop.f32.mrb[13].mxu1  ;;  %v2493_v52 = vld [vmem:[%s3525_s9 + $0x4] ss:$8 sps:$4 sm:$0xff]  }
 0x40b   :  { %v864_v55 = vpop.f32.mrb[14].mxu1  ;;  %v2494_v54 = vld [vmem:[%s3525_s9 + $0x10] ss:$8 sps:$4 sm:$0xff]  }
 0x40c   :  { %v2343_v28 = vpop.f32.mrb[15].mxu1  ;;  %v867_v56 = vsel %vm765_vm3, %v862_v53, -inf  ;;  %v2499_v55 = vld [vmem:[%s3525_s9 + $0x24] ss:$8 sps:$4 sm:$0xff]  }
 0x40d   :  { %868 = vmax.xlane.f32.xlu1 %v867_v56  ;;  %v2497_v28 = vld [vmem:[%s3525_s9 + $0x20] ss:$8 sps:$4 sm:$0xff]   ;;  %v2502_v56 = vld [vmem:[%s3525_s9 + $0x34] ss:$8 sps:$4 sm:$0xff]  }
 0x49a   :  { %v869_v57 = vpop.xlane.xlu1 %868 }
 0x49b   :  { %v870_v58 = vsub.f32 %v862_v53, %v869_v57  ;;  %v2496_v53 = vld [vmem:[%s3525_s9 + $0x14] ss:$8 sps:$4 sm:$0xff]   ;;  %v2500_v57 = vld [vmem:[%s3525_s9 + $0x30] ss:$8 sps:$4 sm:$0xff]  }
 0x49d   :  { %v871_v59 = vmul.f32 1.442695, %v870_v58  ;;  %v2505_v58 = vld [vmem:[%s3525_s9 + $0x44] ss:$8 sps:$4 sm:$0xff]  }
 0x49f   :  { %2632 = vpow2.f32 %v871_v59  ;;  %v2503_v59 = vld [vmem:[%s3525_s9 + $0x40] ss:$8 sps:$4 sm:$0xff]  }
 0x4a9   :  { %v2633_v60 = vpop.eup %2632 }
 0x4aa   :  { %v873_v61 = vsel %vm765_vm3, %v2633_v60, 0.0 }
 0x4ab   :  { %874 = vadd.xlane.f32.xlu1 %v873_v61  ;;  %v2506_v61 = vld [vmem:[%s3525_s9 + $0x50] ss:$8 sps:$4 sm:$0xff]  }
 0x538   :  { %v875_v62 = vpop.xlane.xlu1 %874 }
 0x539   :  { %2634 = vrcp.f32 %v875_v62  ;;  %v2511_v62 = vld [vmem:[%s3525_s9 + $0x64] ss:$8 sps:$4 sm:$0xff]  }
 0x543   :  { %v2635_v1 = vpop.eup %2634 }
 0x544   :  { %v877_v3 = vmul.f32 %v2635_v1, %v2633_v60  ;;  %v2508_v60 = vld [vmem:[%s3525_s9 + $0x54] ss:$8 sps:$4 sm:$0xff]   ;;  %v2509_v1 = vld [vmem:[%s3525_s9 + $0x60] ss:$8 sps:$4 sm:$0xff]  }
 0x546   :  { %v878_v5 = vpack.c.bf16 %v877_v3, %v877_v3  ;;  %v2514_v3 = vld [vmem:[%s3525_s9 + $0x74] ss:$8 sps:$4 sm:$0xff]  }
 0x548   :  { %2347 = vmatmul.mubr.msk.bf16.vlgmr.msra.gmra.mrb[16].mxu1 %vm765_vm3, %v878_v5  ;;  %v2512_v5 = vld [vmem:[%s3525_s9 + $0x70] ss:$8 sps:$4 sm:$0xff]  }
 0x549   :  { %2351 = vmatpush3.bf16.xpose.msra.mxu1 %v926_v7  ;;  %2352 = vmatprep.mubr.msk.bf16.mxu1 %vm2653_vm2, %v2652_v6  ;;  %v2517_v7 = vld [vmem:[%s3525_s9 + $0x84] ss:$8 sps:$4 sm:$0xff]  }
 0x54a   :  { %2356 = vmatprep.subr.bf16.mxu1 %v2652_v6 }
 0x550   :  { %2353 = vmatmul.mubr.bf16.vlgmr.msra.gmra.mrb[20].mxu1 %v925_v10  ;;  %v2520_v10 = vld [vmem:[%s3525_s9 + $0x94] ss:$8 sps:$4 sm:$0xff]  }
 0x551   :  { %2357 = vmatpush3.bf16.msra.mxu1 %v984_v11  ;;  %2358 = vmatprep.mubr.msk.bf16.mxu1 %vm2653_vm2, %v2652_v6  ;;  %v2518_v11 = vld [vmem:[%s3525_s9 + $0x90] ss:$8 sps:$4 sm:$0xff]  }
 0x552   :  { %2362 = vmatprep.subr.bf16.mxu1 %v2652_v6 }
 0x61b   :  { %v3123_v22 = vpop.f32.mrb[16].mxu1 }
 0x61c   :  { %v2348_v4 = vpop.f32.mrb[17].mxu1 }
 0x61d   :  { %v922_v12 = vpop.f32.mrb[18].mxu1  ;;  %v2523_v4 = vld [vmem:[%s3525_s9 + $0xa4] ss:$8 sps:$4 sm:$0xff]  }
 0x61e   :  { %v2349_v14 = vpop.f32.mrb[19].mxu1  ;;  %v2521_v12 = vld [vmem:[%s3525_s9 + $0xa0] ss:$8 sps:$4 sm:$0xff]  }
 0x61f   :  { %v2526_v14 = vld [vmem:[%s3525_s9 + $0xb4] ss:$8 sps:$4 sm:$0xff]  }
 0x623   :  { %v962_v15 = vpop.f32.mrb[20].mxu1 }
 0x624   :  { %v963_v16 = vadd.f32 %v962_v15, %v3081_v2  ;;  %v2354_v18 = vpop.f32.mrb[21].mxu1  ;;  %v2524_v15 = vld [vmem:[%s3525_s9 + $0xb0] ss:$8 sps:$4 sm:$0xff]  }
 0x625   :  { %v965_v20 = vpop.f32.mrb[22].mxu1  ;;  %v2527_v18 = vld [vmem:[%s3525_s9 + $0xc0] ss:$8 sps:$4 sm:$0xff]  }
 0x626   :  { %v2355_v30 = vpop.f32.mrb[23].mxu1  ;;  %v968_v21 = vsel %vm765_vm3, %v963_v16, -inf  ;;  %v2532_v20 = vld [vmem:[%s3525_s9 + $0xd4] ss:$8 sps:$4 sm:$0xff]  }
 0x627   :  { %969 = vmax.xlane.f32.xlu0 %v968_v21  ;;  %v2530_v30 = vld [vmem:[%s3525_s9 + $0xd0] ss:$8 sps:$4 sm:$0xff]   ;;  %v2535_v21 = vld [vmem:[%s3525_s9 + $0xe4] ss:$8 sps:$4 sm:$0xff]  }
 0x6b4   :  { %v970_v23 = vpop.xlane.xlu0 %969 }
 0x6b5   :  { %v971_v24 = vsub.f32 %v963_v16, %v970_v23  ;;  %v2529_v16 = vld [vmem:[%s3525_s9 + $0xc4] ss:$8 sps:$4 sm:$0xff]   ;;  %v2533_v23 = vld [vmem:[%s3525_s9 + $0xe0] ss:$8 sps:$4 sm:$0xff]  }
 0x6b7   :  { %v972_v26 = vmul.f32 1.442695, %v971_v24 }
 0x6b9   :  { %2636 = vpow2.f32 %v972_v26 }
 0x6c3   :  { %v2637_v27 = vpop.eup %2636 }
 0x6c4   :  { %v974_v29 = vsel %vm765_vm3, %v2637_v27, 0.0 }
 0x6c5   :  { %975 = vadd.xlane.f32.xlu1 %v974_v29 }
 0x752   :  { %v976_v31 = vpop.xlane.xlu1 %975 }
 0x753   :  { %2638 = vrcp.f32 %v976_v31  ;;  %v2538_v31 = vld [vmem:[%s3525_s9 + $0xf4] ss:$8 sps:$4 sm:$0xff]  }
 0x75d   :  { %v2639_v33 = vpop.eup %2638 }
 0x75e   :  { %v978_v34 = vmul.f32 %v2639_v33, %v2637_v27  ;;  %v2536_v33 = vld [vmem:[%s3525_s9 + $0xf0] ss:$8 sps:$4 sm:$0xff]  }
 0x760   :  { %v979_v35 = vpack.c.bf16 %v978_v34, %v978_v34 }
 0x762   :  { %2359 = vmatmul.mubr.msk.bf16.vlgmr.msra.gmra.mrb[24].mxu1 %vm765_vm3, %v979_v35 }
 0x763   :  { %2363 = vmatpush3.bf16.xpose.msra.mxu1 %v1027_v36  ;;  %2364 = vmatprep.mubr.msk.bf16.mxu1 %vm2653_vm2, %v2652_v6 }
 0x764   :  { %1333 = vmatprep.subr.bf16.mxu1 %v2493_v52 }
 0x76a   :  { %2365 = vmatmul.mubr.bf16.vlgmr.msra.gmra.mrb[28].mxu1 %v1026_v37 }
 0x835   :  { %v3135_v38 = vpop.f32.mrb[24].mxu1 }
 0x836   :  { %v1127_v39 = vpack.c.bf16 %v3135_v38, %v3106_v17  ;;  %v2360_v40 = vpop.f32.mrb[25].mxu1 }
 0x837   :  { %v1023_v43 = vpop.f32.mrb[26].mxu1 }
 0x838   :  { %v2361_v44 = vpop.f32.mrb[27].mxu1  ;;  %v1161_v43 = vld [vmem:[%s3526_s10] sm:$0x3] }
 0x839   :  { %v1166_v44 = vrot.slane %v1161_v43, %v2965_v9 }
 0x83d   :  { %v1063_v45 = vpop.f32.mrb[28].mxu1 }
 0x83e   :  { %v1064_v25 = vadd.f32 %v1063_v45, %v3081_v2  ;;  %v2366_v46 = vpop.f32.mrb[29].mxu1  ;;  %v2491_v2 = vld [vmem:[%s3525_s9] ss:$8 sps:$4 sm:$0xff]   ;;  %v1170_v45 = vrot.slane %v1161_v43, %v2974_v13 }
 0x83f   :  { %v1066_v47 = vpop.f32.mrb[30].mxu1  ;;  %1334 = vmatpush1.bf16.msra.mxu1 %v2491_v2 }
 0x840   :  { %v2367_v48 = vpop.f32.mrb[31].mxu1  ;;  %v1069_v6 = vsel %vm765_vm3, %v1064_v25, -inf  ;;  %1335 = vmatprep.subr.bf16.mxu1 %v2496_v53  ;;  %v2539_v53 = vld [vmem:[%s3527_s13] ss:$8 sps:$4 sm:$0xff]  }
 0x841   :  { %1070 = vmax.xlane.f32.xlu0 %v1069_v6 }
 0x843   :  { %1336 = vmatpush1.bf16.msra.mxu1 %v2494_v54  ;;  %v2545_v54 = vld [vmem:[%s3527_s13 + $0x20] ss:$8 sps:$4 sm:$0xff]  }
 0x844   :  { %1337 = vmatprep.subr.bf16.mxu1 %v2499_v55  ;;  %v2550_v55 = vld [vmem:[%s3527_s13 + $0x34] ss:$8 sps:$4 sm:$0xff]  }
 0x847   :  { %1338 = vmatpush1.bf16.msra.mxu1 %v2497_v28  ;;  %v2548_v28 = vld [vmem:[%s3527_s13 + $0x30] ss:$8 sps:$4 sm:$0xff]  }
 0x848   :  { %1339 = vmatprep.subr.bf16.mxu1 %v2502_v56  ;;  %v2553_v56 = vld [vmem:[%s3527_s13 + $0x44] ss:$8 sps:$4 sm:$0xff]  }
 0x84b   :  { %1340 = vmatpush1.bf16.msra.mxu1 %v2500_v57  ;;  %v2551_v57 = vld [vmem:[%s3527_s13 + $0x40] ss:$8 sps:$4 sm:$0xff]  }
 0x84c   :  { %1341 = vmatprep.subr.bf16.mxu1 %v2505_v58  ;;  %v2556_v58 = vld [vmem:[%s3527_s13 + $0x54] ss:$8 sps:$4 sm:$0xff]  }
 0x84f   :  { %1342 = vmatpush1.bf16.msra.mxu1 %v2503_v59  ;;  %v2554_v59 = vld [vmem:[%s3527_s13 + $0x50] ss:$8 sps:$4 sm:$0xff]  }
 0x850   :  { %1343 = vmatprep.subr.bf16.mxu1 %v2508_v60  ;;  %v2559_v60 = vld [vmem:[%s3527_s13 + $0x64] ss:$8 sps:$4 sm:$0xff]  }
 0x853   :  { %1344 = vmatpush1.bf16.msra.mxu1 %v2506_v61  ;;  %v2557_v61 = vld [vmem:[%s3527_s13 + $0x60] ss:$8 sps:$4 sm:$0xff]  }
 0x854   :  { %1345 = vmatprep.subr.bf16.mxu1 %v2511_v62 }
 0x857   :  { %1346 = vmatpush1.bf16.msra.mxu1 %v2509_v1 }
 0x858   :  { %1347 = vmatprep.subr.bf16.mxu1 %v2514_v3 }
 0x85b   :  { %1348 = vmatpush1.bf16.msra.mxu1 %v2512_v5 }
 0x85c   :  { %1349 = vmatprep.subr.bf16.mxu1 %v2517_v7 }
 0x85f   :  { %1350 = vmatpush1.bf16.msra.mxu1 %v2515_v8 }
 0x860   :  { %1351 = vmatprep.subr.bf16.mxu1 %v2520_v10 }
 0x863   :  { %1352 = vmatpush1.bf16.msra.mxu1 %v2518_v11 }
 0x864   :  { %1353 = vmatprep.subr.bf16.mxu1 %v2523_v4 }
 0x867   :  { %1354 = vmatpush1.bf16.msra.mxu1 %v2521_v12 }
 0x868   :  { %1355 = vmatprep.subr.bf16.mxu1 %v2526_v14 }
 0x86b   :  { %1356 = vmatpush1.bf16.msra.mxu1 %v2524_v15 }
 0x86c   :  { %1357 = vmatprep.subr.bf16.mxu1 %v2529_v16 }
 0x86f   :  { %1358 = vmatpush1.bf16.msra.mxu1 %v2527_v18 }
 0x870   :  { %1359 = vmatprep.subr.bf16.mxu1 %v2532_v20 }
 0x873   :  { %1360 = vmatpush1.bf16.msra.mxu1 %v2530_v30 }
 0x874   :  { %1361 = vmatprep.subr.bf16.mxu1 %v2535_v21  ;;  %v2562_v21 = vld [vmem:[%s3527_s13 + $0x74] ss:$8 sps:$4 sm:$0xff]  }
 0x877   :  { %1362 = vmatpush1.bf16.msra.mxu1 %v2533_v23  ;;  %v2560_v23 = vld [vmem:[%s3527_s13 + $0x70] ss:$8 sps:$4 sm:$0xff]  }
 0x878   :  { %1363 = vmatprep.subr.bf16.mxu1 %v2538_v31  ;;  %v2571_v31 = vld [vmem:[%s3527_s13 + $0xa4] ss:$8 sps:$4 sm:$0xff]  }
 0x87b   :  { %1364 = vmatpush1.bf16.msra.mxu1 %v2536_v33  ;;  %v2569_v33 = vld [vmem:[%s3527_s13 + $0xa0] ss:$8 sps:$4 sm:$0xff]  }
 0x8ce   :  { %v1071_v49 = vpop.xlane.xlu0 %1070 }
 0x8cf   :  { %v1072_v32 = vsub.f32 %v1064_v25, %v1071_v49 }
 0x8d1   :  { %v1073_v19 = vmul.f32 1.442695, %v1072_v32 }
 0x8d3   :  { %2640 = vpow2.f32 %v1073_v19 }
 0x8dd   :  { %v3141_v50 = vpop.eup %2640 }
 0x8de   :  { %v1075_v51 = vsel %vm765_vm3, %v3141_v50, 0.0 }
 0x8df   :  { %1076 = vadd.xlane.f32.xlu1 %v1075_v51 }
 0x96c   :  { %v1077_v24 = vpop.xlane.xlu1 %1076 }
 0x96d   :  { %2642 = vrcp.f32 %v1077_v24  ;;  %v2565_v24 = vld [vmem:[%s3527_s13 + $0x84] ss:$8 sps:$4 sm:$0xff]  }
 0x977   :  { %v2643_v26 = vpop.eup %2642 }
 0x978   :  { %v1079_v27 = vmul.f32 %v2643_v26, %v3141_v50  ;;  %v2563_v26 = vld [vmem:[%s3527_s13 + $0x80] ss:$8 sps:$4 sm:$0xff]  }
 0x97a   :  { %v1080_v29 = vpack.c.bf16 %v1079_v27, %v1079_v27  ;;  %v2568_v27 = vld [vmem:[%s3527_s13 + $0x94] ss:$8 sps:$4 sm:$0xff]  }
 0x97c   :  { %2371 = vmatmul.mubr.msk.bf16.vlgmr.msra.gmra.mrb[8].mxu0 %vm765_vm3, %v1080_v29  ;;  %v2566_v29 = vld [vmem:[%s3527_s13 + $0x90] ss:$8 sps:$4 sm:$0xff]  }
 0xa4f   :  { %v1121_v34 = vpop.f32.mrb[8].mxu0 }
 0xa50   :  { %v1128_v35 = vpack.c.bf16 %v1121_v34, %v3123_v22  ;;  %v2372_v36 = vpop.f32.mrb[9].mxu0  ;;  %v2572_v34 = vld [vmem:[%s3527_s13 + $0xb0] ss:$8 sps:$4 sm:$0xff]  }
 0xa51   :  { %v1124_v37 = vpop.f32.mrb[10].mxu0  ;;  %v1475_v36 = vld [vmem:[%s3527_s13 + $0xc0] sm:$0xff] }
 0xa52   :  { %v2373_v40 = vpop.f32.mrb[11].mxu0  ;;  %1365 = vmatprep.mubr.bf16.mxu1 %v1128_v35  ;;  %v2574_v35 = vld [vmem:[%s3527_s13 + $0xb4] ss:$8 sps:$4 sm:$0xff]   ;;  %v2264_v37 = vcombine.high %v1475_v36, %v1475_v36 }
 0xa53   :  { %1366 = vmatmul.mubr.bf16.vlgmr.msra.gmra.mrb[32].mxu1 %v1127_v39  ;;  %v2263_v40 = vcombine.low %v1475_v36, %v1475_v36 }
 0xa55   :  { %v1617_v43 = vsel %vm250_vm1, %v2263_v40, 0 }
 0xb26   :  { %v1367_v25 = vpop.f32.mrb[32].mxu1 }
 0xb27   :  { %v1368_v46 = vadd.f32 %v1367_v25, %v1166_v44  ;;  %v1369_v47 = vpop.f32.mrb[33].mxu1 }
 0xb28   :  { %v1370_v22 = vadd.f32 %v1369_v47, %v1170_v45  ;;  %v1371_v48 = vpop.f32.mrb[34].mxu1 }
 0xb29   :  { %v1372_v6 = vadd.f32 %v1371_v48, %v1166_v44  ;;  %v1373_v49 = vpop.f32.mrb[35].mxu1  ;;  %v1376_v17 = vadd.f32 %v1368_v46, %v2947_v63  ;;  %v2542_v63 = vld [vmem:[%s3527_s13 + $0x10] ss:$8 sps:$4 sm:$0xff]   ;;  %v2579_v44 = vld [vmem:[%s3528_s15 + $0x4] ss:$8 sps:$4 sm:$0xff]  }
 0xb2a   :  { %v1377_v32 = vadd.f32 %v1370_v22, %v2888_v41  ;;  %v1374_v19 = vadd.f32 %v1373_v49, %v1170_v45  ;;  %v2541_v41 = vld [vmem:[%s3527_s13 + $0x4] ss:$8 sps:$4 sm:$0xff]   ;;  %v1381_v49 = vld [vmem:[%s3530_s12] sm:$0x3] }
 0xb2b   :  { %v1378_v50 = vadd.f32 %v1372_v6, %v2949_v0  ;;  %1622 = vmatprep.subr.bf16.mxu0 %v2541_v41  ;;  %v2547_v0 = vld [vmem:[%s3527_s13 + $0x24] ss:$8 sps:$4 sm:$0xff]   ;;  %v1380_v6 = vld [vmem:[%s3529_s11] sm:$0x3] }
 0xb2c   :  { %v1379_v38 = vadd.f32 %v1374_v19, %v2890_v42  ;;  %v1382_v39 = vsel %vm246_vm0, %v1377_v32, 0.0  ;;  %v2544_v42 = vld [vmem:[%s3527_s13 + $0x14] ss:$8 sps:$4 sm:$0xff]   ;;  %1623 = vmatpush1.bf16.msra.mxu0 %v2539_v53  ;;  %v1423_v19 = vrot.slane %v1380_v6, %v2965_v9 }
 0xb2d   :  { %v1383_v51 = vadd.f32 %v1382_v39, %v1376_v17  ;;  %1624 = vmatprep.subr.bf16.mxu0 %v2544_v42 }
 0xb2e   :  { %v1386_v2 = vsel %vm246_vm0, %v1379_v38, 0.0 }
 0xb2f   :  { %1384 = vadd.xlane.f32.xlu0 %v1383_v51  ;;  %v1387_v52 = vadd.f32 %v1386_v2, %v1378_v50  ;;  %v1442_v51 = vrot.slane %v1381_v49, %v2974_v13  ;;  %v1438_v2 = vrot.slane %v1381_v49, %v2965_v9 }
 0xb30   :  { %1625 = vmatpush1.bf16.msra.mxu0 %v2542_v63 }
 0xb31   :  { %1388 = vadd.xlane.f32.xlu1 %v1387_v52  ;;  %1626 = vmatprep.subr.bf16.mxu0 %v2547_v0 }
 0xb34   :  { %1627 = vmatpush1.bf16.msra.mxu0 %v2545_v54 }
 0xb35   :  { %1628 = vmatprep.subr.bf16.mxu0 %v2550_v55 }
 0xb38   :  { %1629 = vmatpush1.bf16.msra.mxu0 %v2548_v28 }
 0xb39   :  { %1630 = vmatprep.subr.bf16.mxu0 %v2553_v56 }
 0xb3c   :  { %1631 = vmatpush1.bf16.msra.mxu0 %v2551_v57 }
 0xb3d   :  { %1632 = vmatprep.subr.bf16.mxu0 %v2556_v58 }
 0xb40   :  { %1633 = vmatpush1.bf16.msra.mxu0 %v2554_v59  ;;  %v2577_v59 = vld [vmem:[%s3528_s15] ss:$8 sps:$4 sm:$0xff]  }
 0xb41   :  { %1634 = vmatprep.subr.bf16.mxu0 %v2559_v60  ;;  %v2582_v60 = vld [vmem:[%s3528_s15 + $0x14] ss:$8 sps:$4 sm:$0xff]  }
 0xb44   :  { %1635 = vmatpush1.bf16.msra.mxu0 %v2557_v61  ;;  %v2580_v61 = vld [vmem:[%s3528_s15 + $0x10] ss:$8 sps:$4 sm:$0xff]  }
 0xb45   :  { %1636 = vmatprep.subr.bf16.mxu0 %v2562_v21  ;;  %v2609_v21 = vld [vmem:[%s3528_s15 + $0xa4] ss:$8 sps:$4 sm:$0xff]  }
 0xb48   :  { %1637 = vmatpush1.bf16.msra.mxu0 %v2560_v23  ;;  %v2607_v23 = vld [vmem:[%s3528_s15 + $0xa0] ss:$8 sps:$4 sm:$0xff]  }
 0xb49   :  { %1638 = vmatprep.subr.bf16.mxu0 %v2565_v24  ;;  %v2612_v24 = vld [vmem:[%s3528_s15 + $0xb4] ss:$8 sps:$4 sm:$0xff]  }
 0xb4c   :  { %1639 = vmatpush1.bf16.msra.mxu0 %v2563_v26  ;;  %v2610_v26 = vld [vmem:[%s3528_s15 + $0xb0] ss:$8 sps:$4 sm:$0xff]  }
 0xb4d   :  { %1640 = vmatprep.subr.bf16.mxu0 %v2568_v27  ;;  %v1695_v27 = vld [vmem:[%s3528_s15 + $0xc0] sm:$0xff] }
 0xb50   :  { %1641 = vmatpush1.bf16.msra.mxu0 %v2566_v29  ;;  %v2292_v29 = vcombine.high %v1695_v27, %v1695_v27 }
 0xb51   :  { %1642 = vmatprep.subr.bf16.mxu0 %v2571_v31  ;;  %v2291_v31 = vcombine.low %v1695_v27, %v1695_v27 }
 0xb54   :  { %1643 = vmatpush1.bf16.msra.mxu0 %v2569_v33  ;;  %v1837_v33 = vsel %vm250_vm1, %v2291_v31, 0  ;;  %v2622_v31 = vld [vmem:[%s3533_s19 + $0x38] sm:$0xff]  }
 0xb55   :  { %1644 = vmatprep.subr.bf16.mxu0 %v2574_v35 }
 0xb58   :  { %1645 = vmatpush1.bf16.msra.mxu0 %v2572_v34  ;;  %v1476_v34 = vld [vmem:[%s3531_s14] sm:$0x3] }
 0xb59   :  { %2265 = vmatprep.subr.msk.bf16.mxu0 %vm250_vm1, %v2264_v37  ;;  %v1481_v35 = vrot.slane %v1476_v34, %v2965_v9  ;;  %v1485_v36 = vrot.slane %v1476_v34, %v2974_v13  ;;  %v2624_v34 = vld [vmem:[%s3533_s19 + $0x48] sm:$0xff]  }
 0xb5c   :  { %1647 = vmatpush1.bf16.msra.mxu0 %v1617_v43 }
 0xb5d   :  { %1842 = vmatprep.subr.bf16.mxu0 %v2579_v44 }
 0xbbc   :  { %v1385_v62 = vpop.xlane.xlu0 %1384 }
 0xbbd   :  { %v1391_v1 = vmul.f32 0.005, %v1385_v62  ;;  %v2585_v62 = vld [vmem:[%s3528_s15 + $0x24] ss:$8 sps:$4 sm:$0xff]  }
 0xbbe   :  { %v1389_v3 = vpop.xlane.xlu1 %1388 }
 0xbbf   :  { %v1393_v5 = vsub.f32 %v1376_v17, %v1391_v1  ;;  %v1394_v7 = vsub.f32 %v1377_v32, %v1391_v1  ;;  %v1392_v8 = vmul.f32 0.005, %v1389_v3  ;;  %v1427_v32 = vrot.slane %v1380_v6, %v2974_v13  ;;  %v2583_v1 = vld [vmem:[%s3528_s15 + $0x20] ss:$8 sps:$4 sm:$0xff]   ;;  %v2588_v3 = vld [vmem:[%s3528_s15 + $0x34] ss:$8 sps:$4 sm:$0xff]  }
 0xbc1   :  { %v1395_v10 = vsub.f32 %v1378_v50, %v1392_v8  ;;  %v1396_v11 = vsub.f32 %v1379_v38, %v1392_v8  ;;  %v1397_v4 = vmul.f32 %v1393_v5, %v1393_v5  ;;  %v1398_v12 = vmul.f32 %v1394_v7, %v1394_v7  ;;  %v2589_v8 = vld [vmem:[%s3528_s15 + $0x40] ss:$8 sps:$4 sm:$0xff]  }
 0xbc3   :  { %v1401_v14 = vsel %vm246_vm0, %v1398_v12, 0.0  ;;  %v1399_v15 = vmul.f32 %v1395_v10, %v1395_v10  ;;  %v1400_v16 = vmul.f32 %v1396_v11, %v1396_v11  ;;  %v2595_v12 = vld [vmem:[%s3528_s15 + $0x60] ss:$8 sps:$4 sm:$0xff]  }
 0xbc4   :  { %v1402_v18 = vadd.f32 %v1401_v14, %v1397_v4  ;;  %v2597_v4 = vld [vmem:[%s3528_s15 + $0x64] ss:$8 sps:$4 sm:$0xff]   ;;  %v2600_v14 = vld [vmem:[%s3528_s15 + $0x74] ss:$8 sps:$4 sm:$0xff]  }
 0xbc5   :  { %v1405_v20 = vsel %vm246_vm0, %v1400_v16, 0.0  ;;  %v2603_v16 = vld [vmem:[%s3528_s15 + $0x84] ss:$8 sps:$4 sm:$0xff]  }
 0xbc6   :  { %1403 = vadd.xlane.f32.xlu0 %v1402_v18  ;;  %v1406_v30 = vadd.f32 %v1405_v20, %v1399_v15  ;;  %v2598_v15 = vld [vmem:[%s3528_s15 + $0x70] ss:$8 sps:$4 sm:$0xff]   ;;  %v2601_v18 = vld [vmem:[%s3528_s15 + $0x80] ss:$8 sps:$4 sm:$0xff]   ;;  %v2606_v20 = vld [vmem:[%s3528_s15 + $0x94] ss:$8 sps:$4 sm:$0xff]  }
 0xbc8   :  { %1407 = vadd.xlane.f32.xlu1 %v1406_v30  ;;  %v2604_v30 = vld [vmem:[%s3528_s15 + $0x90] ss:$8 sps:$4 sm:$0xff]  }
 0xc53   :  { %v1404_v45 = vpop.xlane.xlu0 %1403 }
 0xc54   :  { %v1409_v25 = vmul.f32 0.005, %v1404_v45 }
 0xc55   :  { %v1408_v46 = vpop.xlane.xlu1 %1407 }
 0xc56   :  { %v1411_v47 = vadd.f32 1e-05, %v1409_v25  ;;  %v1410_v22 = vmul.f32 0.005, %v1408_v46 }
 0xc58   :  { %2644 = vrsqrt.f32 %v1411_v47  ;;  %v1412_v48 = vadd.f32 1e-05, %v1410_v22 }
 0xc5a   :  { %2646 = vrsqrt.f32 %v1412_v48 }
 0xc62   :  { %v2645_v17 = vpop.eup %2644 }
 0xc63   :  { %v1415_v38 = vmul.f32 %v2645_v17, %v1393_v5  ;;  %v1416_v39 = vmul.f32 %v2645_v17, %v1394_v7  ;;  %v2586_v5 = vld [vmem:[%s3528_s15 + $0x30] ss:$8 sps:$4 sm:$0xff]   ;;  %v2591_v7 = vld [vmem:[%s3528_s15 + $0x44] ss:$8 sps:$4 sm:$0xff]   ;;  %v1696_v17 = vld [vmem:[%s3532_s16] sm:$0x3] }
 0xc64   :  { %v2647_v50 = vpop.eup %2646 }
 0xc65   :  { %v1417_v52 = vmul.f32 %v2647_v50, %v1395_v10  ;;  %v1418_v53 = vmul.f32 %v2647_v50, %v1396_v11  ;;  %v1431_v41 = vmul.f32 %v1427_v32, %v1416_v39  ;;  %v1430_v42 = vmul.f32 %v1423_v19, %v1415_v38  ;;  %v2594_v10 = vld [vmem:[%s3528_s15 + $0x54] ss:$8 sps:$4 sm:$0xff]   ;;  %v2592_v11 = vld [vmem:[%s3528_s15 + $0x50] ss:$8 sps:$4 sm:$0xff]  }
 0xc66   :  { %v1701_v38 = vrot.slane %v1696_v17, %v2965_v9  ;;  %v1705_v39 = vrot.slane %v1696_v17, %v2974_v13 }
 0xc67   :  { %v1433_v63 = vmul.f32 %v1427_v32, %v1418_v53  ;;  %v1432_v0 = vmul.f32 %v1423_v19, %v1417_v52  ;;  %v3350_v54 = vadd.f32 %v1442_v51, %v1431_v41  ;;  %v3354_v28 = vadd.f32 %v1438_v2, %v1430_v42 }
 0xc69   :  { %v3352_v55 = vadd.f32 %v1442_v51, %v1433_v63  ;;  %v3356_v56 = vadd.f32 %v1438_v2, %v1432_v0 }
 0xc6b   :  { %v1450_v57 = vpack.c.bf16 %v3352_v55, %v3350_v54  ;;  %v1449_v58 = vpack.c.bf16 %v3356_v56, %v3354_v28 }
 0xc6d   :  { %2266 = vmatprep.mubr.msk.bf16.mxu0 %vm246_vm0, %v1450_v57 }
 0xc6e   :  { %1655 = vmatmul.mubr.bf16.vlgmr.msra.gmra.mrb[12].mxu0 %v1449_v58 }
 0xc6f   :  { %1843 = vmatpush1.bf16.msra.mxu0 %v2577_v59 }
 0xc70   :  { %1844 = vmatprep.subr.bf16.mxu0 %v2582_v60 }
 0xc73   :  { %1845 = vmatpush1.bf16.msra.mxu0 %v2580_v61 }
 0xc74   :  { %1846 = vmatprep.subr.bf16.mxu0 %v2585_v62 }
 0xc77   :  { %1847 = vmatpush1.bf16.msra.mxu0 %v2583_v1 }
 0xc78   :  { %1848 = vmatprep.subr.bf16.mxu0 %v2588_v3  ;;  %v2654_v3 = vmov 0  }
 0xc79   :  { %2072 = vmatprep.subr.bf16.mxu1 %v2654_v3 }
 0xc7b   :  { %1849 = vmatpush1.bf16.msra.mxu0 %v2586_v5  ;;  %v2619_v5 = vld [vmem:[%s3533_s19 + $0x20] sm:$0xff]  }
 0xc7c   :  { %1850 = vmatprep.subr.bf16.mxu0 %v2591_v7  ;;  %v2620_v7 = vld [vmem:[%s3533_s19 + $0x28] sm:$0xff]  }
 0xc7f   :  { %1851 = vmatpush1.bf16.msra.mxu0 %v2589_v8  ;;  %v2621_v8 = vld [vmem:[%s3533_s19 + $0x30] sm:$0xff]  }
 0xc80   :  { %1852 = vmatprep.subr.bf16.mxu0 %v2594_v10 }
 0xc83   :  { %1853 = vmatpush1.bf16.msra.mxu0 %v2592_v11 }
 0xc84   :  { %1854 = vmatprep.subr.bf16.mxu0 %v2597_v4 }
 0xc87   :  { %1855 = vmatpush1.bf16.msra.mxu0 %v2595_v12 }
 0xc88   :  { %1856 = vmatprep.subr.bf16.mxu0 %v2600_v14 }
 0xc8b   :  { %1857 = vmatpush1.bf16.msra.mxu0 %v2598_v15 }
 0xc8c   :  { %1858 = vmatprep.subr.bf16.mxu0 %v2603_v16 }
 0xc8f   :  { %1859 = vmatpush1.bf16.msra.mxu0 %v2601_v18 }
 0xc90   :  { %1860 = vmatprep.subr.bf16.mxu0 %v2606_v20 }
 0xc93   :  { %1861 = vmatpush1.bf16.msra.mxu0 %v2604_v30 }
 0xc94   :  { %1862 = vmatprep.subr.bf16.mxu0 %v2609_v21 }
 0xc97   :  { %1863 = vmatpush1.bf16.msra.mxu0 %v2607_v23 }
 0xc98   :  { %1864 = vmatprep.subr.bf16.mxu0 %v2612_v24 }
 0xc9b   :  { %1865 = vmatpush1.bf16.msra.mxu0 %v2610_v26 }
 0xc9c   :  { %2293 = vmatprep.subr.msk.bf16.mxu0 %vm250_vm1, %v2292_v29 }
 0xc9f   :  { %1867 = vmatpush1.bf16.msra.mxu0 %v1837_v33  ;;  %v2623_v33 = vld [vmem:[%s3533_s19 + $0x40] sm:$0xff]  }
 0xd41   :  { %v1656_v37 = vpop.f32.mrb[12].mxu0 }
 0xd42   :  { %v1657_v40 = vadd.f32 %v1656_v37, %v1481_v35  ;;  %v1658_v43 = vpop.f32.mrb[13].mxu0  ;;  %v2627_v37 = vld [vmem:[%s3533_s19 + $0x60] ss:$0 sps:$4 sm:$0xff]  }
 0xd43   :  { %v1659_v44 = vadd.f32 %v1658_v43, %v1485_v36  ;;  %v1660_v45 = vpop.f32.mrb[14].mxu0 }
 0xd44   :  { %v1661_v25 = vadd.f32 %v1660_v45, %v1481_v35  ;;  %v1662_v46 = vpop.f32.mrb[15].mxu0  ;;  %v1665_v22 = vmax.f32 %v1657_v40, 0.0  ;;  %v2625_v35 = vld [vmem:[%s3533_s19 + $0x50] sm:$0xff]   ;;  %v2070_v40 = vsel %vm250_vm1, %v2627_v37, 0 }
 0xd45   :  { %v1663_v47 = vadd.f32 %v1662_v46, %v1485_v36  ;;  %v1666_v6 = vmax.f32 %v1659_v44, 0.0  ;;  %v2626_v36 = vld [vmem:[%s3533_s19 + $0x58] sm:$0xff]  }
 0xd46   :  { %v1667_v48 = vmax.f32 %v1661_v25, 0.0 }
 0xd47   :  { %v1668_v49 = vmax.f32 %v1663_v47, 0.0 }
 0xd48   :  { %v1669_v32 = vpack.c.bf16 %v1667_v48, %v1665_v22  ;;  %v1889_v22 = vld [vmem:[%s3534_s17] sm:$0x3] }
 0xd49   :  { %v1670_v19 = vpack.c.bf16 %v1668_v49, %v1666_v6  ;;  %v1890_v48 = vld [vmem:[%s3535_s18] sm:$0x3]  ;;  %v1935_v6 = vrot.slane %v1889_v22, %v2974_v13  ;;  %v1931_v49 = vrot.slane %v1889_v22, %v2965_v9 }
 0xd4b   :  { %2294 = vmatprep.mubr.msk.bf16.mxu0 %vm246_vm0, %v1670_v19 }
 0xd4c   :  { %1875 = vmatmul.mubr.bf16.vlgmr.msra.gmra.mrb[16].mxu0 %v1669_v32 }
 0xe1f   :  { %v1876_v50 = vpop.f32.mrb[16].mxu0 }
 0xe20   :  { %v1877_v51 = vadd.f32 %v1876_v50, %v1701_v38  ;;  %v1878_v2 = vpop.f32.mrb[17].mxu0  ;;  %v1946_v50 = vrot.slane %v1890_v48, %v2965_v9 }
 0xe21   :  { %v1879_v52 = vadd.f32 %v1878_v2, %v1705_v39  ;;  %v1880_v53 = vpop.f32.mrb[18].mxu0 }
 0xe22   :  { %v1881_v41 = vadd.f32 %v1880_v53, %v1701_v38  ;;  %v1882_v42 = vpop.f32.mrb[19].mxu0  ;;  %v1885_v57 = vadd.f32 %v1877_v51, %v3354_v28  ;;  %v2617_v28 = vld [vmem:[%s3533_s19 + $0x10] sm:$0xff]  }
 0xe23   :  { %v1886_v63 = vadd.f32 %v1879_v52, %v3350_v54  ;;  %v1883_v0 = vadd.f32 %v1882_v42, %v1705_v39  ;;  %v2615_v54 = vld [vmem:[%s3533_s19] sm:$0xff]   ;;  %v1950_v39 = vrot.slane %v1890_v48, %v2974_v13 }
 0xe24   :  { %v1887_v60 = vadd.f32 %v1881_v41, %v3356_v56  ;;  %2073 = vmatpush1.bf16.msra.mxu1 %v2615_v54  ;;  %v2618_v56 = vld [vmem:[%s3533_s19 + $0x18] sm:$0xff]   ;;  %v2295_v13 = vld [vmem:[%s3536_s20] ss:$0 sm:$0xff] }
 0xe25   :  { %v1888_v58 = vadd.f32 %v1883_v0, %v3352_v55  ;;  %v1891_v59 = vsel %vm246_vm0, %v1886_v63, 0.0  ;;  %v2616_v55 = vld [vmem:[%s3533_s19 + $0x8] sm:$0xff]   ;;  %2074 = vmatprep.subr.bf16.mxu1 %v2654_v3 }
 0xe26   :  { %v1892_v61 = vadd.f32 %v1891_v59, %v1885_v57 }
 0xe27   :  { %v1895_v62 = vsel %vm246_vm0, %v1888_v58, 0.0 }
 0xe28   :  { %1893 = vadd.xlane.f32.xlu0 %v1892_v61  ;;  %v1896_v1 = vadd.f32 %v1895_v62, %v1887_v60  ;;  %2075 = vmatpush1.bf16.msra.mxu1 %v2616_v55 }
 0xe29   :  { %2076 = vmatprep.subr.bf16.mxu1 %v2654_v3 }
 0xe2a   :  { %1897 = vadd.xlane.f32.xlu1 %v1896_v1 }
 0xe2c   :  { %2077 = vmatpush1.bf16.msra.mxu1 %v2617_v28 }
 0xe2d   :  { %2078 = vmatprep.subr.bf16.mxu1 %v2654_v3 }
 0xe30   :  { %2079 = vmatpush1.bf16.msra.mxu1 %v2618_v56 }
 0xe31   :  { %2080 = vmatprep.subr.bf16.mxu1 %v2654_v3 }
 0xe34   :  { %2081 = vmatpush1.bf16.msra.mxu1 %v2619_v5 }
 0xe35   :  { %2082 = vmatprep.subr.bf16.mxu1 %v2654_v3 }
 0xe38   :  { %2083 = vmatpush1.bf16.msra.mxu1 %v2620_v7 }
 0xe39   :  { %2084 = vmatprep.subr.bf16.mxu1 %v2654_v3 }
 0xe3c   :  { %2085 = vmatpush1.bf16.msra.mxu1 %v2621_v8 }
 0xe3d   :  { %2086 = vmatprep.subr.bf16.mxu1 %v2654_v3 }
 0xe40   :  { %2087 = vmatpush1.bf16.msra.mxu1 %v2622_v31 }
 0xe41   :  { %2088 = vmatprep.subr.bf16.mxu1 %v2654_v3 }
 0xe44   :  { %2089 = vmatpush1.bf16.msra.mxu1 %v2623_v33 }
 0xe45   :  { %2090 = vmatprep.subr.bf16.mxu1 %v2654_v3 }
 0xe48   :  { %2091 = vmatpush1.bf16.msra.mxu1 %v2624_v34 }
 0xe49   :  { %2092 = vmatprep.subr.bf16.mxu1 %v2654_v3 }
 0xe4c   :  { %2093 = vmatpush1.bf16.msra.mxu1 %v2625_v35 }
 0xe4d   :  { %2094 = vmatprep.subr.bf16.mxu1 %v2654_v3 }
 0xe50   :  { %2095 = vmatpush1.bf16.msra.mxu1 %v2626_v36 }
 0xe51   :  { %2096 = vmatprep.subr.bf16.mxu1 %v2654_v3 }
 0xe54   :  { %2097 = vmatpush1.bf16.msra.mxu1 %v2070_v40 }
 0xeb5   :  { %v1894_v10 = vpop.xlane.xlu0 %1893 }
 0xeb6   :  { %v1899_v11 = vmul.f32 0.005, %v1894_v10 }
 0xeb7   :  { %v1898_v4 = vpop.xlane.xlu1 %1897 }
 0xeb8   :  { %v1901_v12 = vsub.f32 %v1885_v57, %v1899_v11  ;;  %v1902_v14 = vsub.f32 %v1886_v63, %v1899_v11  ;;  %v1900_v15 = vmul.f32 0.005, %v1898_v4 }
 0xeba   :  { %v1903_v16 = vsub.f32 %v1887_v60, %v1900_v15  ;;  %v1904_v18 = vsub.f32 %v1888_v58, %v1900_v15  ;;  %v1905_v20 = vmul.f32 %v1901_v12, %v1901_v12  ;;  %v1906_v30 = vmul.f32 %v1902_v14, %v1902_v14 }
 0xebc   :  { %v1909_v21 = vsel %vm246_vm0, %v1906_v30, 0.0  ;;  %v1907_v23 = vmul.f32 %v1903_v16, %v1903_v16  ;;  %v1908_v24 = vmul.f32 %v1904_v18, %v1904_v18 }
 0xebd   :  { %v1910_v26 = vadd.f32 %v1909_v21, %v1905_v20 }
 0xebe   :  { %v1913_v27 = vsel %vm246_vm0, %v1908_v24, 0.0 }
 0xebf   :  { %1911 = vadd.xlane.f32.xlu0 %v1910_v26  ;;  %v1914_v29 = vadd.f32 %v1913_v27, %v1907_v23 }
 0xec1   :  { %1915 = vadd.xlane.f32.xlu1 %v1914_v29 }
 0xf4c   :  { %v1912_v43 = vpop.xlane.xlu0 %1911 }
 0xf4d   :  { %v1917_v44 = vmul.f32 0.005, %v1912_v43 }
 0xf4e   :  { %v1916_v45 = vpop.xlane.xlu1 %1915 }
 0xf4f   :  { %v1919_v25 = vadd.f32 1e-05, %v1917_v44  ;;  %v1918_v46 = vmul.f32 0.005, %v1916_v45 }
 0xf51   :  { %2648 = vrsqrt.f32 %v1919_v25  ;;  %v1920_v47 = vadd.f32 1e-05, %v1918_v46 }
 0xf53   :  { %2650 = vrsqrt.f32 %v1920_v47 }
 0xf5b   :  { %v2649_v32 = vpop.eup %2648 }
 0xf5c   :  { %v1923_v19 = vmul.f32 %v2649_v32, %v1901_v12  ;;  %v1924_v17 = vmul.f32 %v2649_v32, %v1902_v14 }
 0xf5d   :  { %v2651_v38 = vpop.eup %2650 }
 0xf5e   :  { %v1925_v51 = vmul.f32 %v2651_v38, %v1903_v16  ;;  %v1926_v2 = vmul.f32 %v2651_v38, %v1904_v18  ;;  %v1939_v52 = vmul.f32 %v1935_v6, %v1924_v17  ;;  %v1938_v53 = vmul.f32 %v1931_v49, %v1923_v19 }
 0xf60   :  { %v1941_v41 = vmul.f32 %v1935_v6, %v1926_v2  ;;  %v1940_v42 = vmul.f32 %v1931_v49, %v1925_v51  ;;  %v1954_v63 = vadd.f32 %v1950_v39, %v1939_v52  ;;  %v1953_v57 = vadd.f32 %v1946_v50, %v1938_v53 }
 0xf62   :  { %v1956_v0 = vadd.f32 %v1950_v39, %v1941_v41  ;;  %v1955_v58 = vadd.f32 %v1946_v50, %v1940_v42 }
 0xf64   :  { %v1958_v59 = vpack.c.bf16 %v1956_v0, %v1954_v63  ;;  %v1957_v60 = vpack.c.bf16 %v1955_v58, %v1953_v57 }
 0xf66   :  { %2309 = vmatprep.mubr.msk.bf16.mxu1 %vm246_vm0, %v1958_v59 }
 0xf67   :  { %2105 = vmatmul.mubr.bf16.vlgmr.msra.gmra.mrb[36].mxu1 %v1957_v60 }
0x103a   :  { %v2106_v9 = vpop.f32.mrb[36].mxu1 }
0x103b   :  { %v2107_v61 = vadd.f32 %v2295_v13, %v2106_v9  ;;  %v2108_v62 = vpop.f32.mrb[37].mxu1 }
0x103c   :  { %v2109_v1 = vpop.f32.mrb[38].mxu1 }
0x103d   :  { %2113 = vst [vmem:[%s3537_s21] sm:$0xff] %v2107_v61  ;;  %v2110_v3 = vadd.f32 %v2295_v13, %v2109_v1  ;;  %v2111_v54 = vpop.f32.mrb[39].mxu1 }
0x103f   :  { %2114 = vst [vmem:[%s3537_s21 + $0x8] sm:$0xff] %v2110_v3 }

</bundles_post_ra>
